<compile_context>
chip_gen: v6e
topology: v6e:2x2x1
jax: 0.10.0
libtpu: 0.0.40
codegen_flags: <defaults>
</compile_context>

<pallas_src>
import jax
import jax.numpy as jnp
from jax import lax
from jax.experimental import pallas as pl
from jax.experimental.pallas import tpu as pltpu


_MiB = 1024 * 1024
_XY_TILE_TARGET_BYTES = 2 * _MiB     # target size of one (TZ, X, Y) input tile (pass A)
_COL_TILE_BUDGET = 16 * _MiB         # pass-B budget for double-buffered in+out column tiles
_PREC = lax.Precision.HIGHEST        # true-f32 MXU accumulation (op is HBM-bound anyway)


# ------------------------------ small helpers --------------------------------

def _round_up(v, m):
    return ((v + m - 1) // m) * m


def _largest_divisor_leq(n, cap):
    cap = max(1, min(n, int(cap)))
    for d in range(cap, 0, -1):
        if n % d == 0:
            return d
    return 1


def _vmem_limit(nbytes):
    """Size-derived scoped-VMEM cap with headroom, kept inside v7x's 64 MiB/TC."""
    return int(min(56 * _MiB, max(16 * _MiB, int(nbytes) + 8 * _MiB)))


# ------------------------------ Pallas kernels -------------------------------

def _xy_blur_kernel(u_ref, bx_ref, byr_ref, o_ref):
    """(TZ, X, Y) tile:  out[z] = Bx @ (u[z] @ ByR)   (Y-axis then X-axis blur)."""
    tz, X, Y = u_ref.shape
    u = u_ref[...]
    # Y blur: one lane-dim matmul on the flattened (TZ*X, Y) view.
    r = jnp.dot(u.reshape(tz * X, Y), byr_ref[...],
                preferred_element_type=jnp.float32, precision=_PREC)
    r = r.reshape(tz, X, Y)
    # X blur: batched MXU matmul over the Z batch (Bx broadcast once per step).
    bx = jnp.broadcast_to(bx_ref[...], (tz, X, X))
    r = jnp.einsum("zab,zby->zay", bx, r,
                   preferred_element_type=jnp.float32, precision=_PREC)
    o_ref[...] = r.astype(o_ref.dtype)


def _z_blur_kernel(bz_ref, a_ref, o_ref):
    """(Z, TC) column tile of the flattened volume:  out = Bz @ a."""
    o_ref[...] = jnp.dot(bz_ref[...], a_ref[...],
                         preferred_element_type=jnp.float32,
                         precision=_PREC).astype(o_ref.dtype)


# ------------------------------ pass wrappers --------------------------------

def _blur_xy(u, bx, byr, tz):
    """Pass A: X- and Y-axis blur, TZ Z-slices per grid step."""
    Z, X, Y = u.shape
    buf_bytes = 4 * (4 * tz * X * Y + 2 * (X * X + Y * Y))
    cost = pl.CostEstimate(
        flops=int(2 * Z * X * Y * (X + Y)),
        transcendentals=0,
        bytes_accessed=int(4 * (2 * Z * X * Y + X * X + Y * Y)),
    )
    return pl.pallas_call(
        _xy_blur_kernel,
        out_shape=jax.ShapeDtypeStruct((Z, X, Y), jnp.float32),
        grid=(Z // tz,),
        in_specs=[
            pl.BlockSpec((tz, X, Y), lambda i: (i, 0, 0)),
            pl.BlockSpec((X, X), lambda i: (0, 0)),      # VMEM-resident weight
            pl.BlockSpec((Y, Y), lambda i: (0, 0)),      # VMEM-resident weight
        ],
        out_specs=pl.BlockSpec((tz, X, Y), lambda i: (i, 0, 0)),
        compiler_params=pltpu.CompilerParams(
            dimension_semantics=("parallel",),
            vmem_limit_bytes=_vmem_limit(buf_bytes),
        ),
        cost_estimate=cost,
    )(u, bx, byr)


def _pick_col_tile(Z, cols):
    """Lane-dense column tile for pass B, sized from the VMEM budget and split
    into >=2 tiles where possible (v7x megacore)."""
    max_tc = max(128, (_COL_TILE_BUDGET // (16 * Z)) // 128 * 128)
    if cols > max_tc:
        return int(max_tc)
    if cols >= 256:
        half = _round_up((cols + 1) // 2, 128)
        if half < cols:
            return int(half)
    return int(cols)


def _blur_z(a3d, bz):
    """Pass B: Z-axis blur as Bz @ (Z, X*Y), over lane-dense column tiles."""
    Z, X, Y = a3d.shape
    cols = X * Y
    a2d = a3d.reshape(Z, cols)               # contiguous HBM reshape: free
    tc = _pick_col_tile(Z, cols)
    buf_bytes = 4 * (4 * Z * tc + 2 * Z * Z)
    cost = pl.CostEstimate(
        flops=int(2 * Z * Z * cols),
        transcendentals=0,
        bytes_accessed=int(4 * (2 * Z * cols + Z * Z)),
    )
    out2d = pl.pallas_call(
        _z_blur_kernel,
        out_shape=jax.ShapeDtypeStruct((Z, cols), jnp.float32),
        grid=(pl.cdiv(cols, tc),),
        in_specs=[
            pl.BlockSpec((Z, Z), lambda j: (0, 0)),      # VMEM-resident weight
            pl.BlockSpec((Z, tc), lambda j: (0, j)),
        ],
        out_specs=pl.BlockSpec((Z, tc), lambda j: (0, j)),
        compiler_params=pltpu.CompilerParams(
            dimension_semantics=("parallel",),
            vmem_limit_bytes=_vmem_limit(buf_bytes),
        ),
        cost_estimate=cost,
    )(bz, a2d)
    return out2d.reshape(Z, X, Y)


# ------------------------ folded per-axis operators ---------------------------

def _gaussian_circulant(N, sigma):
    """Spatial-domain equivalent of separable_fourier_filter(N, sigma):
    circular convolution with the wrapped, normalized Gaussian k, i.e. the
    symmetric circulant C[m, n] = k[(n - m) mod 2N]."""
    k = jnp.arange(-N, N, dtype=jnp.float32) ** 2 / (2.0 * float(sigma) ** 2)
    k = jnp.concatenate((k[N:], k[:N]))      # fftshift: kernel peak at index 0
    k = jnp.exp(-k)
    k = k / jnp.sum(k)
    L = 2 * N
    idx = (jnp.arange(L)[None, :] - jnp.arange(L)[:, None]) % L
    return k[idx].astype(jnp.float32)        # (L, L), symmetric


def _replicate_pad_matrix(D, p):
    """(D + 2p, D) one-hot matrix of replicate ('edge') padding along one axis."""
    src = jnp.clip(jnp.arange(-p, D + p), 0, D - 1)
    return (src[:, None] == jnp.arange(D)[None, :]).astype(jnp.float32)


def _axis_operator(D, p, sigma):
    """Folded  crop ∘ periodic-blur ∘ replicate-pad  operator for one axis: (D, D)."""
    L = D + 2 * p
    # The FFT filter has length 2*((D+2p)//2); odd padded extents would silently
    # mismatch in the original torch module too.
    assert L % 2 == 0, f"padded extent must be even, got {L}"
    C = _gaussian_circulant(L // 2, sigma)    # (L, L)
    P = _replicate_pad_matrix(D, p)           # (L, D)
    return jnp.dot(C[p:p + D, :], P, precision=_PREC)   # (D, D)


# ---------------------------------- module ------------------------------------

class GeneralGaussianBlur3DNotPeriodic:
    """JAX/Pallas port of curvatubes GeneralGaussianBlur3D_notperiodic."""

    def __init__(self, Z, X, Y, sig_z, sig_x, sig_y, padding_mode="replicate",
                 xy_tile_target_bytes=_XY_TILE_TARGET_BYTES):
        if None not in [sig_z, sig_x, sig_y]:
            self.trivial = False
            assert padding_mode == "replicate"
            self.Z, self.X, self.Y = Z, X, Y
            self.pad_z = int(3 * sig_z)
            self.pad_x = int(3 * sig_x)
            self.pad_y = int(3 * sig_y)
            # Pad + periodic blur + crop folded into one (D, D) operator per axis.
            self.Bz = _axis_operator(Z, self.pad_z, sig_z)        # left-mul along Z
            self.Bx = _axis_operator(X, self.pad_x, sig_x)        # left-mul along X
            self.ByR = _axis_operator(Y, self.pad_y, sig_y).T     # right-mul along Y
            # Z-batch for pass A: biggest exact divisor of Z whose input tile fits
            # the target bytes; keep >=2 grid steps when Z allows (megacore).
            slab = max(1, X * Y * 4)
            tz_cap = max(1, xy_tile_target_bytes // slab)
            self.tz = _largest_divisor_leq(Z, min(tz_cap, (Z + 1) // 2))
        else:
            self.trivial = True

    def __call__(self, u):
        if self.trivial:
            return u
        assert u.shape == (self.Z, self.X, self.Y), u.shape
        u = u.astype(jnp.float32)
        a = _blur_xy(u, self.Bx, self.ByR, self.tz)   # X+Y blur, Z-batched tiles
        return _blur_z(a, self.Bz)                    # Z blur on the (Z, X*Y) view


# -------------------------- pure-JAX FFT reference ----------------------------

def _sep_fourier_filter(N, sigma):
    k = jnp.arange(-N, N, dtype=jnp.float32) ** 2 / (2.0 * sigma ** 2)
    k = jnp.concatenate((k[N:], k[:N]))
    k = jnp.exp(-k)
    k = k / jnp.sum(k)
    return jnp.fft.fft(k)


def _blur_periodic_ref(u, fk, fi, fj):
    fu = jnp.fft.fft(u, axis=-1) * fj
    u_c = jnp.transpose(jnp.fft.ifft(fu, axis=-1), (0, 2, 1))
    fu = jnp.fft.fft(u_c, axis=-1) * fi
    u_c = jnp.transpose(jnp.fft.ifft(fu, axis=-1), (2, 1, 0))
    fu = jnp.fft.fft(u_c, axis=-1) * fk
    u_c = jnp.transpose(jnp.fft.ifft(fu, axis=-1), (2, 0, 1))
    return jnp.real(u_c)


def _reference_forward(u, Z, X, Y, sig_z, sig_x, sig_y):
    pz, px, py = int(3 * sig_z), int(3 * sig_x), int(3 * sig_y)
    fk = _sep_fourier_filter((Z + 2 * pz) // 2, sig_z)
    fi = _sep_fourier_filter((X + 2 * px) // 2, sig_x)
    fj = _sep_fourier_filter((Y + 2 * py) // 2, sig_y)
    u_pad = jnp.pad(u, ((pz, pz), (px, px), (py, py)), mode="edge")
    u_pad = _blur_periodic_ref(u_pad, fk, fi, fj)
    return u_pad[pz:-pz, px:-px, py:-py]


# ----------------------------------- main -------------------------------------

if __name__ == "__main__":
    key = jax.random.PRNGKey(0)

    def _check(Z, X, Y, sigs):
        u = jax.random.normal(jax.random.fold_in(key, Z * 10000 + X * 100 + Y),
                              (Z, X, Y), dtype=jnp.float32)
        blur = GeneralGaussianBlur3DNotPeriodic(Z, X, Y, *sigs)
        out = jax.block_until_ready(blur(u))
        assert out.shape == (Z, X, Y), out.shape
        assert out.dtype == jnp.float32
        ref = jax.block_until_ready(_reference_forward(u, Z, X, Y, *sigs))
        err = float(jnp.max(jnp.abs(out - ref.astype(jnp.float32))))
        assert err < 1e-3, f"mismatch vs FFT reference at ({Z},{X},{Y}): {err}"

    # small cube: 2-step pass A (TZ=8) and 2-step lane-dense pass B (tc=128)
    _check(16, 16, 16, (2.0, 1.5, 1.0))
    # wide lanes: Y=128, pass B splits 1024 columns into two 512-wide tiles
    _check(16, 8, 128, (1.0, 1.0, 2.0))
    # non-multiple-of-128 columns: exercises the padded/masked edge block in pass B
    _check(8, 24, 40, (1.0, 1.5, 0.8))

    # trivial path (any sigma None) must be the identity
    u0 = jax.random.normal(key, (16, 16, 16), dtype=jnp.float32)
    ident = GeneralGaussianBlur3DNotPeriodic(16, 16, 16, None, 1.0, 1.0)
    assert jnp.array_equal(ident(u0), u0)

    print("KERNEL_OK")
</pallas_src>

<mosaic_0001>
module attributes {stable_mosaic.version = 11 : i64} {
  func.func @_xy_blur_kernel(%arg0: i32, %arg1: memref<8x16x16xf32, #tpu.memory_space<vmem>>, %arg2: memref<16x16xf32, #tpu.memory_space<vmem>>, %arg3: memref<16x16xf32, #tpu.memory_space<vmem>>, %arg4: memref<8x16x16xf32, #tpu.memory_space<vmem>>) attributes {dimension_semantics = [#tpu.dimension_semantics<parallel>], iteration_bounds = array<i64: 2>, scalar_prefetch = 0 : i64, scratch_operands = 0 : i64, tpu.core_type = #tpu.core_type<tc>, window_params = [{transform_indices = @transform_0, window_bounds = array<i64: 8, 16, 16>}, {pipeline_mode = #tpu.pipeline_mode<synchronous>, transform_indices = @transform_1, window_bounds = array<i64: 16, 16>}, {pipeline_mode = #tpu.pipeline_mode<synchronous>, transform_indices = @transform_2, window_bounds = array<i64: 16, 16>}, {transform_indices = @transform_3, window_bounds = array<i64: 8, 16, 16>}]} {
    %c0 = arith.constant 0 : index
    %c0_0 = arith.constant 0 : index
    %c0_1 = arith.constant 0 : index
    %0 = vector.load %arg1[%c0, %c0_0, %c0_1] : memref<8x16x16xf32, #tpu.memory_space<vmem>>, vector<8x16x16xf32>
    %1 = vector.shape_cast %0 : vector<8x16x16xf32> to vector<128x16xf32>
    %c0_2 = arith.constant 0 : index
    %c0_3 = arith.constant 0 : index
    %2 = vector.load %arg3[%c0_2, %c0_3] : memref<16x16xf32, #tpu.memory_space<vmem>>, vector<16x16xf32>
    %cst = arith.constant dense<0.000000e+00> : vector<128x16xf32>
    %3 = tpu.matmul %1, %2, %cst {dimension_numbers = #tpu.dot_dimension_numbers<[1], [0], [0], [1], [0, 0, 1, 1], [], []>, precision = #tpu.contract_precision<fp32>} : vector<128x16xf32>, vector<16x16xf32>, vector<128x16xf32> -> vector<128x16xf32>
    %4 = vector.shape_cast %3 : vector<128x16xf32> to vector<8x16x16xf32>
    %c0_4 = arith.constant 0 : index
    %c0_5 = arith.constant 0 : index
    %5 = vector.load %arg2[%c0_4, %c0_5] : memref<16x16xf32, #tpu.memory_space<vmem>>, vector<16x16xf32>
    %6 = vector.shape_cast %5 : vector<16x16xf32> to vector<1x16x16xf32>
    %7 = vector.broadcast %6 : vector<1x16x16xf32> to vector<8x16x16xf32>
    "tpu.trace_start"() <{level = 10 : i32, message = "zab,zby->zay"}> : () -> ()
    %cst_6 = arith.constant dense<0.000000e+00> : vector<8x16x16xf32>
    %8 = tpu.matmul %7, %4, %cst_6 {dimension_numbers = #tpu.dot_dimension_numbers<[2], [1], [1], [2], [0, 0, 0, 1, 1, 2], [0], [0]>, precision = #tpu.contract_precision<fp32>} : vector<8x16x16xf32>, vector<8x16x16xf32>, vector<8x16x16xf32> -> vector<8x16x16xf32>
    "tpu.trace_stop"() : () -> ()
    %c0_7 = arith.constant 0 : index
    %c0_8 = arith.constant 0 : index
    %c0_9 = arith.constant 0 : index
    %9 = vector.load %arg4[%c0_7, %c0_8, %c0_9] : memref<8x16x16xf32, #tpu.memory_space<vmem>>, vector<8x16x16xf32>
    tpu.vector_store %arg4[%c0_7, %c0_8, %c0_9], %8 {strides = array<i32>} : memref<8x16x16xf32, #tpu.memory_space<vmem>>, vector<8x16x16xf32>,
    return
  }
  func.func @transform_0(%arg0: i32) -> (i32, i32, i32) {
    %c0_i32 = arith.constant 0 : i32
    %c0_i32_0 = arith.constant 0 : i32
    %c0_i32_1 = arith.constant 0 : i32
    return %arg0, %c0_i32, %c0_i32_0 : i32, i32, i32
  }
  func.func @transform_1(%arg0: i32) -> (i32, i32) {
    %c0_i32 = arith.constant 0 : i32
    %c0_i32_0 = arith.constant 0 : i32
    %c0_i32_1 = arith.constant 0 : i32
    return %c0_i32, %c0_i32_0 : i32, i32
  }
  func.func @transform_2(%arg0: i32) -> (i32, i32) {
    %c0_i32 = arith.constant 0 : i32
    %c0_i32_0 = arith.constant 0 : i32
    %c0_i32_1 = arith.constant 0 : i32
    return %c0_i32, %c0_i32_0 : i32, i32
  }
  func.func @transform_3(%arg0: i32) -> (i32, i32, i32) {
    %c0_i32 = arith.constant 0 : i32
    %c0_i32_0 = arith.constant 0 : i32
    %c0_i32_1 = arith.constant 0 : i32
    return %arg0, %c0_i32, %c0_i32_0 : i32, i32, i32
  }
}

</mosaic_0001>

<bundles_post_ra>
// kernel: tpu_custom_call.1
= control target key start
LH: loop header
LB: loop body
LE: loop exit
PB: predicated region body
PF: predicated region fallthrough
CT: control target
= control target key end

     0   :  { %8 = vsyncpa [#allocation3], 0  ;;  %s7490_s0 = inlined_call_operand.hbm [shape: f32[16,16,16], index: 0, kind: input, shape index: {}]   ;;  %s7491_s1 = inlined_call_operand.hbm [shape: f32[16,16], index: 1, kind: input, shape index: {}]   ;;  %s7492_s2 = inlined_call_operand.hbm [shape: f32[16,16], index: 2, kind: input, shape index: {}]   ;;  %s7493_s3 = inlined_call_operand.hbm [shape: f32[16,16,16], index: 3, kind: output, shape index: {}]  }
   0x1   :  { %10 = vsyncpa [#allocation3 + $0x1], 0 }
   0x2   :  { %11 = vsyncpa [#allocation6], 0 }
   0x3   :  { %12 = vsyncpa [#allocation4], 0 }
   0x4   :  { %14 = vsyncpa [#allocation4 + $0x1], 0  ;;  %s6616_s12 = smov 0   ;;  %s6618_s13 = smov 0  }
   0x5   :  { %s6620_s14 = smov 0   ;;  %s6622_s15 = smov 0  }
   0x6 LB: > { %s6637_s16 = sadd.s32 4294967295, %s6586_s15   ;;  %s5539_s17 = sadd.s32 4294967294, %s6586_s15   ;;  %s6586_s15 = sphi %s6622_s15, %s7514_s15   ;;  %s6582_s14 = sphi %s6620_s14, %s7513_s14   ;;  %s6578_s13 = sphi %s6618_s13, %s7512_s13   ;;  %s6574_s12 = sphi %s6616_s12, %s7511_s12  }
   0x7   : > { %p40_p0 = scmp.ne.s32.totalorder %s6578_s13, %s6574_s12  ;;  %p7494_p1 = scmp.eq.s32.totalorder %s6637_s16, 0 }
   0x8   : > { %p106_p2 = scmp.eq.s32.totalorder %s6637_s16, 1  ;;  %p112_p3 = scmp.eq.s32.totalorder %s5539_s17, 1 }
   0x9   : > { %p6646_p4 = por %p7494_p1, %p40_p0  ;;  %p5540_p5 = scmp.ge.s32.totalorder %s6586_s15, 1 }
   0xa   : > { %p6651_p6 = por %p112_p3, %p40_p0  ;;  %p119_p7 = scmp.lt.s32.totalorder %s6586_s15, 3 }
   0xb   : > { %s7498_s18 = scalar_select %p6646_p4, 1, 0 }
   0xc   : > { %s7499_s19 = scalar_select %p6651_p6, 1, 0 }
   0xd   : > { %p6656_p8 = pnand %p5540_p5, %p119_p7  ;;  %s6588_s21 = smov [#allocation5]  }
   0xe   : > { %s131_s22 = sshll.u32 %s6588_s21, 4  ;;  %s6589_s24 = smov [#allocation7]   ;;  %s132_s22 = int_to_ptr.vmem [resolvable:$true] %s131_s22 }
   0xf   : > { %s7500_s20 = scalar_select %p6656_p8, 1, 0 }
  0x10   : > { %p6379_p9 = pneg %p6656_p8  ;;  %s144_s25 = sshll.u32 %s6589_s24, 4  ;;  %s145_s25 = int_to_ptr.vmem [resolvable:$true] %s144_s25 }
  0x11   : > { %s6449_s26 = scalar_lea.vmem %s132_s22, 256  ;;  %p6457_p5 = scmp.lt.s32.totalorder %s132_s22, %s132_s22 }
  0x12   : > { %p6665_p11 = pnand %p6379_p9, %p7494_p1  ;;  %p6450_p13 = scmp.ne.s32.totalorder %s132_s22, %s6449_s26 }
  0x13   : > { %p6458_p7 = scmp.lt.s32.totalorder %s6449_s26, %s6449_s26 }
  0x14   : > { %p6440_p12 = pneg %p6665_p11 }
  0x15   : > { %p6459_p10 = por %p6458_p7, %p6457_p5 }
  0x16   : > { %p6452_p0 = pnand %p6450_p13, %p6440_p12 }
  0x18   : > { %p6453_p3 = pneg %p6452_p0 }
  0x1a   : > { %p6460_p9 = pnand %p6459_p10, %p6453_p3 }
  0x1c   : > { %6463 = shalt.err (!%p6460_p9)
}
  0x1d   : > { %s6590_s27 = smov 128   ;;  %s6591_s28 = smov 8  }
  0x1e   : > { %6382 = dma.hbm_to_vmem [thread:$0]  (!%p6665_p11), %s7491_s1, 256, %s132_s22, [#allocation6], %s6590_s27, %s6590_s27, %s6591_s28  }
  0x1f   : > { %s6475_s4 = scalar_lea.vmem %s145_s25, 256  ;;  %p6483_p10 = scmp.lt.s32.totalorder %s145_s25, %s145_s25 }
  0x20   : > { %p6476_p13 = scmp.ne.s32.totalorder %s145_s25, %s6475_s4  ;;  %p6484_p3 = scmp.lt.s32.totalorder %s6475_s4, %s6475_s4 }
  0x22   : > { %p6478_p0 = pnand %p6476_p13, %p6440_p12  ;;  %p6485_p7 = por %p6484_p3, %p6483_p10 }
  0x24   : > { %p6479_p5 = pneg %p6478_p0 }
  0x26   : > { %p6486_p9 = pnand %p6485_p7, %p6479_p5 }
  0x28   : > { %6489 = shalt.err (!%p6486_p9)
}
  0x29   : > { %6385 = dma.hbm_to_vmem [thread:$0]  (!%p6665_p11), %s7492_s2, 256, %s145_s25, [#allocation6], %s6590_s27, %s6590_s27, %s6591_s28  }
  0x2a   : > { %s6694_s7 = sadd.s32 1, %s6586_s15   ;;  %s27_s8 = sadd.s32 1, %s6582_s14 }
  0x2b   : > { %s24_s9 = ssub.s32 %s6586_s15, %s6694_s7  ;;  %p34_p12 = scmp.ne.s32.totalorder %s6582_s14, %s6578_s13 }
  0x2c   : > { %p25_p13 = scmp.eq.s32.totalorder %s24_s9, 0  ;;  %p35_p0 = scmp.eq.s32.totalorder %s6586_s15, 0 }
  0x2d   : > { %p6704_p5 = por %p106_p2, %p34_p12  ;;  %p6396_p10 = scmp.lt.s32.totalorder %s6586_s15, 2 }
  0x2e   : > { %s6710_s11 = scalar_select %p25_p13, %s6582_s14, %s27_s8  }
  0x2f   : > { %s7502_s10 = scalar_select %p6704_p5, 1, 0 }
  0x30   : > { %p36_p3 = por %p35_p0, %p34_p12  ;;  %s158_s17 = sand.u32 1, %s6582_s14  }
  0x31   : > { %s5544_s21 = sshll.u32 %s158_s17, 7  ;;  %s5560_s22 = sshll.u32 %s6586_s15, 11 }
  0x32   : > { %s6717_s25 = scalar_lea.hbm %s7490_s0, %s5560_s22  ;;  %s162_s26 = scalar_lea.vmem [#allocation2], %s5544_s21 }
  0x33   : > { %s170_s29 = sshll.u32 %s162_s26, 4  ;;  %p6721_p2 = pnand %p6396_p10, %p36_p3  ;;  %s6719_s29 = int_to_ptr.vmem [resolvable:$true] %s170_s29 }
  0x34   : > { %s6725_s4 = scalar_lea.sflag [#allocation3], %s158_s17  ;;  %s6490_s5 = scalar_lea.hbm %s6717_s25, 2048 }
  0x35   : > { %p6491_p11 = scmp.ne.s32.totalorder %s6717_s25, %s6490_s5  ;;  %p6492_p7 = pneg %p6721_p2 }
  0x36   : > { %s6495_s9 = scalar_lea.hbm %s7490_s0, 4096  ;;  %p6496_p13 = scmp.lt.s32.totalorder %s6717_s25, %s7490_s0 }
  0x37   : > { %p6493_p9 = pnand %p6492_p7, %p6491_p11  ;;  %p6497_p0 = scmp.lt.s32.totalorder %s6495_s9, %s6490_s5 }
  0x39   : > { %p6494_p12 = pneg %p6493_p9  ;;  %p6498_p10 = por %p6497_p0, %p6496_p13 }
  0x3b   : > { %p6499_p3 = pnand %p6498_p10, %p6494_p12 }
  0x3d   : > { %6502 = shalt.err (!%p6499_p3)
}
  0x3e   : > { %s6503_s17 = scalar_lea.vmem %s6719_s29, 2048  ;;  %s6592_s23 = smov [#allocation2]  }
  0x3f   : > { %p6504_p1 = scmp.ne.s32.totalorder %s6719_s29, %s6503_s17  ;;  %s6508_s24 = sshll.u32 %s6592_s23, 4  ;;  %s6509_s24 = int_to_ptr.vmem [resolvable:$false] %s6508_s24 }
  0x40   : > { %s6510_s26 = scalar_lea.vmem %s6509_s24, 4096  ;;  %p6511_p9 = scmp.lt.s32.totalorder %s6719_s29, %s6509_s24 }
  0x41   : > { %p6506_p6 = pnand %p6504_p1, %p6492_p7  ;;  %p6512_p5 = scmp.lt.s32.totalorder %s6510_s26, %s6503_s17 }
  0x43   : > { %p6507_p11 = pneg %p6506_p6  ;;  %p6513_p4 = por %p6512_p5, %p6511_p9 }
  0x45   : > { %p6514_p8 = pnand %p6513_p4, %p6507_p11 }
  0x47   : > { %6517 = shalt.err (!%p6514_p8)
}
  0x48   : > { %6389 = dma.hbm_to_vmem [thread:$0]  (!%p6721_p2), %s6717_s25, 2048, %s6719_s29, %s6725_s4, %s6590_s27, %s6590_s27, %s6591_s28  }
  0x49   : > { %p7504_p1 = scmp.ne.s32.totalorder %s7500_s20, 0 }
  0x4a   : > { %s6752_s5 = sand.u32 (!%p7504_p1), 1, %s6578_s13   ;;  %p7505_p4 = scmp.ne.s32.totalorder (!%p7504_p1), %s7498_s18, 0 }
  0x4b   : > { %182 = sbr.rel (%p7504_p1) target bundleno = 718 (0x2ce), region = 32  ;;  %s5549_s6 = sshll.u32 (!%p7504_p1), %s6752_s5, 7 }
  0x4c   : > { %s185_s8 = scalar_lea.sflag (!%p7504_p1), [#allocation3], %s6752_s5  ;;  %s6758_s30 = scalar_lea.vmem (!%p7504_p1), [#allocation2], %s5549_s6 }
  0x50   : > { %6561 = dma.done.wait (%p7505_p4), %s185_s8, 2048  }
  0x51   : > { %6563 = vsyncadd (%p7505_p4), %s185_s8, 4294965248  ;;  %p7506_p6 = scmp.eq.s32.totalorder %s6637_s16, 0 }
  0x53   : > { %6565 = dma.done.wait (%p7506_p6), [#allocation6], 512   ;;  %p7507_p8 = pmov %p7506_p6 }
  0x54   : > { %vm239_vm0 = vcmask 130048   ;;  %v238_v0 = vld [vmem:[#allocation7 + $0x8] sm:$0xff]  ;;  %v237_v1 = vld [vmem:[#allocation7] sm:$0xff]  ;;  %v221_v2 = vld [vmem:[%s6758_s30] sm:$0xff]  ;;  %s7406_s18 = scalar_lea.vmem [#allocation8], %s5549_s6  ;;  %s5562_s20 = sshll.u32 %s6637_s16, 11 }
  0x55   : > { %6567 = vsyncadd (%p7507_p8), [#allocation6], 4294966784  ;;  %v6769_v3 = vand.u32 4294901760, %v238_v0  ;;  %v6771_v4 = vand.u32 4294901760, %v237_v1  ;;  %v241_v5 = vsel %vm239_vm0, %v221_v2, 0  ;;  %v222_v6 = vld [vmem:[%s6758_s30 + $0x8] sm:$0xff]  ;;  %s7441_s29 = scalar_lea.hbm %s7493_s3, %s5562_s20 }
  0x56   : > { %v223_v7 = vld [vmem:[%s6758_s30 + $0x10] sm:$0xff]  ;;  %v224_v8 = vld [vmem:[%s6758_s30 + $0x18] sm:$0xff]  ;;  %v6777_v9 = vand.u32 4294901760, %v241_v5  ;;  %v244_v10 = vsel %vm239_vm0, %v222_v6, 0  ;;  %v225_v13 = vld [vmem:[%s6758_s30 + $0x20] sm:$0xff]  ;;  %s5447_s27 = sshll.u32 %s7406_s18, 4  ;;  %s7443_s27 = int_to_ptr.vmem [resolvable:$true] %s5447_s27 }
  0x57   : > { %v247_v11 = vsel %vm239_vm0, %v223_v7, 0  ;;  %v250_v12 = vsel %vm239_vm0, %v224_v8, 0  ;;  %v226_v14 = vld [vmem:[%s6758_s30 + $0x28] sm:$0xff]  ;;  %5863 = vmatprep.subr.mxu0 %v6769_v3  ;;  %v6786_v15 = vsub.f32 %v238_v0, %v6769_v3  ;;  %v6788_v16 = vand.u32 4294901760, %v244_v10  ;;  %v227_v39 = vld [vmem:[%s6758_s30 + $0x30] sm:$0xff]  ;;  %v228_v40 = vld [vmem:[%s6758_s30 + $0x38] sm:$0xff] }
  0x58   : > { %v6791_v17 = vsub.f32 %v237_v1, %v6771_v4  ;;  %v6793_v18 = vand.u32 4294901760, %v247_v11  ;;  %5864 = vmatpush3.msra.mxu0 %v6769_v3  ;;  %v6797_v19 = vsub.f32 %v241_v5, %v6777_v9  ;;  %5895 = vmatprep.mubr.f32.mxu1 %v6777_v9  ;;  %v6800_v20 = vand.u32 4294901760, %v250_v12  ;;  %v229_v49 = vld [vmem:[%s6758_s30 + $0x40] sm:$0xff]  ;;  %v230_v50 = vld [vmem:[%s6758_s30 + $0x48] sm:$0xff]  ;;  %v231_v51 = vld [vmem:[%s6758_s30 + $0x50] sm:$0xff]  ;;  %s5433_s16 = scalar_lea.sflag [#allocation4], %s6752_s5 }
  0x59   : > { %v253_v21 = vsel %vm239_vm0, %v225_v13, 0  ;;  %v256_v22 = vsel %vm239_vm0, %v226_v14, 0  ;;  %5865 = vmatprep.subr.mxu0 %v6771_v4  ;;  %v6806_v23 = vand.u32 4294901760, %v6786_v15  ;;  %v6809_v24 = vsub.f32 %v244_v10, %v6788_v16  ;;  %v232_v60 = vld [vmem:[%s6758_s30 + $0x58] sm:$0xff]  ;;  %v233_v1 = vld [vmem:[%s6758_s30 + $0x60] sm:$0xff]  ;;  %v234_v13 = vld [vmem:[%s6758_s30 + $0x68] sm:$0xff] }
  0x5a   : > { %v6812_v25 = vand.u32 4294901760, %v6791_v17  ;;  %v6815_v26 = vsub.f32 %v247_v11, %v6793_v18  ;;  %5866 = vmatpush3.msra.mxu0 %v6771_v4  ;;  %v357_v27 = vand.u32 4294901760, %v6797_v19  ;;  %v6820_v28 = vsub.f32 %v250_v12, %v6800_v20  ;;  %s6518_s4 = scalar_lea.vmem %s7443_s27, 2048  ;;  %p7508_p2 = scmp.ne.s32.totalorder %s7502_s10, 0 }
  0x5b   : > { %v6822_v29 = vand.u32 4294901760, %v253_v21  ;;  %v6824_v30 = vand.u32 4294901760, %v256_v22  ;;  %v547_v31 = vsub.f32 %v6786_v15, %v6806_v23  ;;  %v367_v32 = vand.u32 4294901760, %v6809_v24  ;;  %5919 = vmatprep.subr.mxu0 %v6786_v15  ;;  %p6519_p5 = scmp.ne.s32.totalorder %s7443_s27, %s6518_s4  ;;  %s6593_s9 = smov [#allocation8]  }
  0x5c   : > { %v554_v33 = vsub.f32 %v6791_v17, %v6812_v25  ;;  %v377_v34 = vand.u32 4294901760, %v6815_v26  ;;  %v358_v35 = vsub.f32 %v6797_v19, %v357_v27  ;;  %v387_v36 = vand.u32 4294901760, %v6820_v28  ;;  %s6522_s21 = sshll.u32 %s6593_s9, 4  ;;  %s6523_s21 = int_to_ptr.vmem [resolvable:$false] %s6522_s21 }
  0x5d   : > { %v6838_v37 = vsub.f32 %v253_v21, %v6822_v29  ;;  %v6841_v38 = vsub.f32 %v256_v22, %v6824_v30  ;;  %v548_v41 = vand.u32 4294901760, %v547_v31  ;;  %v368_v42 = vsub.f32 %v6809_v24, %v367_v32  ;;  %p6520_p7 = pnand %p6519_p5, %p7508_p2  ;;  %s6524_s22 = scalar_lea.vmem %s6523_s21, 4096 }
  0x5e   : > { %v555_v43 = vand.u32 4294901760, %v554_v33  ;;  %v378_v44 = vsub.f32 %v6815_v26, %v377_v34  ;;  %v359_v45 = vand.u32 4294901760, %v358_v35  ;;  %v388_v46 = vsub.f32 %v6820_v28, %v387_v36  ;;  %p6525_p13 = scmp.lt.s32.totalorder %s7443_s27, %s6523_s21  ;;  %p6526_p0 = scmp.lt.s32.totalorder %s6524_s22, %s6518_s4 }
  0x5f   : > { %v397_v47 = vand.u32 4294901760, %v6838_v37  ;;  %v407_v48 = vand.u32 4294901760, %v6841_v38  ;;  %5891 = vmatprep.subr.mxu1 %v548_v41  ;;  %v369_v52 = vand.u32 4294901760, %v368_v42  ;;  %v259_v54 = vsel %vm239_vm0, %v227_v39, 0  ;;  %p6521_p12 = pneg %p6520_p7 }
  0x60   : > { %v379_v53 = vand.u32 4294901760, %v378_v44  ;;  %v262_v55 = vsel %vm239_vm0, %v228_v40, 0  ;;  %5867 = vmatprep.mubr.f32.mxu0 %v359_v45  ;;  %5892 = vmatpush3.msra.mxu1 %v548_v41  ;;  %v389_v56 = vand.u32 4294901760, %v388_v46  ;;  %v6867_v59 = vand.u32 4294901760, %v259_v54  ;;  %p6527_p10 = por %p6526_p0, %p6525_p13 }
  0x61   : > { %v398_v57 = vsub.f32 %v6838_v37, %v397_v47  ;;  %v408_v58 = vsub.f32 %v6841_v38, %v407_v48  ;;  %5868 = vmatmul.mubr.f32.vlgmr.msra.gmra.mxu0 %v369_v52  ;;  %5893 = vmatprep.subr.mxu1 %v555_v43  ;;  %v6870_v61 = vand.u32 4294901760, %v262_v55  ;;  %v265_v62 = vsel %vm239_vm0, %v229_v49, 0 }
  0x62   : > { %v268_v63 = vsel %vm239_vm0, %v230_v50, 0  ;;  %v271_v0 = vsel %vm239_vm0, %v231_v51, 0  ;;  %5894 = vmatpush3.msra.mxu1 %v555_v43  ;;  %5870 = vmatprep.mubr.f32.mxu0 %v379_v53  ;;  %v6877_v6 = vsub.f32 %v259_v54, %v6867_v59  ;;  %v6879_v7 = vand.u32 4294901760, %v265_v62  ;;  %v235_v50 = vld [vmem:[%s6758_s30 + $0x70] sm:$0xff]  ;;  %p6528_p3 = pnand %p6527_p10, %p6521_p12 }
  0x63   : > { %v399_v2 = vand.u32 4294901760, %v398_v57  ;;  %v409_v5 = vand.u32 4294901760, %v408_v58  ;;  %5896 = vmatmul.mubr.f32.vlgmr.msra.gmra.mxu1 %v6788_v16  ;;  %v6883_v8 = vsub.f32 %v262_v55, %v6870_v61  ;;  %v6885_v10 = vand.u32 4294901760, %v268_v63  ;;  %5920 = vmatpush3.msra.mxu0 %v6786_v15  ;;  %v236_v57 = vld [vmem:[%s6758_s30 + $0x78] sm:$0xff] }
  0x64   : > { %v6887_v11 = vand.u32 4294901760, %v271_v0  ;;  %v274_v12 = vsel %vm239_vm0, %v232_v60, 0  ;;  %5898 = vmatprep.mubr.f32.mxu1 %v6793_v18  ;;  %v417_v14 = vand.u32 4294901760, %v6877_v6  ;;  %v6895_v21 = vsub.f32 %v265_v62, %v6879_v7  ;;  %5921 = vmatprep.subr.mxu0 %v6791_v17 }
  0x65   : > { %v6897_v22 = vand.u32 4294901760, %v274_v12  ;;  %v277_v31 = vsel %vm239_vm0, %v233_v1, 0  ;;  %5871 = vmatmul.mubr.f32.gmra.mxu0 %v389_v56  ;;  %v427_v33 = vand.u32 4294901760, %v6883_v8  ;;  %v6903_v35 = vsub.f32 %v268_v63, %v6885_v10  ;;  %5947 = vmatprep.subr.mxu1 %v6769_v3 }
  0x66   : > { %v6906_v15 = vsub.f32 %v271_v0, %v6887_v11  ;;  %v6908_v39 = vand.u32 4294901760, %v277_v31  ;;  %5873 = vmatprep.mubr.f32.mxu0 %v399_v2  ;;  %v418_v40 = vsub.f32 %v6877_v6, %v417_v14  ;;  %v437_v41 = vand.u32 4294901760, %v6895_v21  ;;  %5922 = vmatpush3.msra.mxu0 %v6791_v17 }
  0x67   : > { %v6916_v42 = vsub.f32 %v274_v12, %v6897_v22  ;;  %v280_v43 = vsel %vm239_vm0, %v234_v13, 0  ;;  %5899 = vmatmul.mubr.f32.gmra.mxu1 %v6800_v20  ;;  %v428_v44 = vsub.f32 %v6883_v8, %v427_v33  ;;  %v447_v45 = vand.u32 4294901760, %v6903_v35  ;;  %5975 = vmatprep.subr.mxu0 %v6806_v23 }
  0x68   : > { %v457_v46 = vand.u32 4294901760, %v6906_v15  ;;  %v6927_v49 = vsub.f32 %v277_v31, %v6908_v39  ;;  %5901 = vmatprep.mubr.f32.mxu1 %v6822_v29  ;;  %v419_v17 = vand.u32 4294901760, %v418_v40  ;;  %v438_v51 = vsub.f32 %v6895_v21, %v437_v41  ;;  %5948 = vmatpush3.msra.mxu1 %v6769_v3 }
  0x69   : > { %v467_v52 = vand.u32 4294901760, %v6916_v42  ;;  %v6936_v53 = vand.u32 4294901760, %v280_v43  ;;  %5874 = vmatmul.mubr.f32.gmra.mxu0 %v409_v5  ;;  %v429_v54 = vand.u32 4294901760, %v428_v44  ;;  %v448_v55 = vsub.f32 %v6903_v35, %v447_v45  ;;  %5949 = vmatprep.subr.mxu1 %v6771_v4 }
  0x6a   : > { %v458_v56 = vsub.f32 %v6906_v15, %v457_v46  ;;  %5876 = vmatprep.mubr.f32.mxu0 %v419_v17  ;;  %v439_v58 = vand.u32 4294901760, %v438_v51  ;;  %v477_v60 = vand.u32 4294901760, %v6927_v49  ;;  %v283_v63 = vsel %vm239_vm0, %v235_v50, 0  ;;  %5950 = vmatpush3.msra.mxu1 %v6771_v4 }
  0x6b   : > { %v6949_v62 = vsub.f32 %v280_v43, %v6936_v53  ;;  %5902 = vmatmul.mubr.f32.gmra.mxu1 %v6824_v30  ;;  %v6954_v0 = vand.u32 4294901760, %v283_v63  ;;  %6003 = vmatprep.subr.mxu1 %v6769_v3  ;;  %v468_v1 = vsub.f32 %v6916_v42, %v467_v52  ;;  %v286_v2 = vsel %vm239_vm0, %v236_v57, 0 }
  0x6c   : > { %5904 = vmatprep.mubr.f32.mxu1 %v6867_v59  ;;  %v449_v5 = vand.u32 4294901760, %v448_v55  ;;  %v6966_v31 = vand.u32 4294901760, %v286_v2  ;;  %v459_v40 = vand.u32 4294901760, %v458_v56  ;;  %v478_v43 = vsub.f32 %v6927_v49, %v477_v60 }
  0x6d   : > { %5877 = vmatmul.mubr.f32.gmra.mxu0 %v429_v54  ;;  %v487_v12 = vand.u32 4294901760, %v6949_v62  ;;  %v6964_v13 = vsub.f32 %v283_v63, %v6954_v0  ;;  %v469_v17 = vand.u32 4294901760, %v468_v1 }
  0x6e   : > { %5879 = vmatprep.mubr.f32.mxu0 %v439_v58  ;;  %v6974_v50 = vsub.f32 %v286_v2, %v6966_v31  ;;  %v479_v55 = vand.u32 4294901760, %v478_v43 }
  0x6f   : > { %5905 = vmatmul.mubr.f32.gmra.mxu1 %v6870_v61  ;;  %v497_v44 = vand.u32 4294901760, %v6964_v13  ;;  %v488_v51 = vsub.f32 %v6949_v62, %v487_v12 }
  0x70   : > { %5907 = vmatprep.mubr.f32.mxu1 %v6879_v7  ;;  %v507_v54 = vand.u32 4294901760, %v6974_v50 }
  0x71   : > { %5880 = vmatmul.mubr.f32.gmra.mxu0 %v449_v5  ;;  %v498_v56 = vsub.f32 %v6964_v13, %v497_v44  ;;  %v489_v57 = vand.u32 4294901760, %v488_v51 }
  0x72   : > { %5882 = vmatprep.mubr.f32.mxu0 %v459_v40  ;;  %v508_v58 = vsub.f32 %v6974_v50, %v507_v54 }
  0x73   : > { %5908 = vmatmul.mubr.f32.gmra.mxu1 %v6885_v10  ;;  %v499_v63 = vand.u32 4294901760, %v498_v56 }
  0x74   : > { %5910 = vmatprep.mubr.f32.mxu1 %v6887_v11  ;;  %v509_v1 = vand.u32 4294901760, %v508_v58 }
  0x75   : > { %5883 = vmatmul.mubr.f32.gmra.mxu0 %v469_v17 }
  0x76   : > { %5885 = vmatprep.mubr.f32.mxu0 %v479_v55 }
  0x77   : > { %5911 = vmatmul.mubr.f32.gmra.mxu1 %v6897_v22 }
  0x78   : > { %5913 = vmatprep.mubr.f32.mxu1 %v6908_v39 }
  0x79   : > { %5886 = vmatmul.mubr.f32.gmra.mxu0 %v489_v57 }
  0x7a   : > { %5888 = vmatprep.mubr.f32.mxu0 %v499_v63 }
  0x7b   : > { %5914 = vmatmul.mubr.f32.gmra.mxu1 %v6936_v53 }
  0x7c   : > { %5916 = vmatprep.mubr.f32.mxu1 %v6954_v0 }
  0x7d   : > { %5889 = vmatmul.mubr.f32.gmra.mxu0 %v509_v1 }
  0x7e   : > { %5923 = vmatprep.mubr.f32.mxu0 %v6797_v19 }
  0x7f   : > { %5917 = vmatmul.mubr.f32.gmra.mxu1 %v6966_v31 }
  0x80   : > { %5951 = vmatprep.mubr.f32.mxu1 %v357_v27 }
  0x81   : > { %5924 = vmatmul.mubr.f32.vlgmr.msra.gmra.mxu0 %v6809_v24 }
  0x82   : > { %5926 = vmatprep.mubr.f32.mxu0 %v6815_v26  ;;  %5976 = vmatpush3.msra.mxu0 %v6806_v23 }
  0x83   : > { %5952 = vmatmul.mubr.f32.vlgmr.msra.gmra.mxu1 %v367_v32  ;;  %5977 = vmatprep.subr.mxu0 %v6812_v25 }
  0x84   : > { %5954 = vmatprep.mubr.f32.mxu1 %v377_v34  ;;  %5978 = vmatpush3.msra.mxu0 %v6812_v25 }
  0x85   : > { %5927 = vmatmul.mubr.f32.gmra.mxu0 %v6820_v28  ;;  %6004 = vmatpush3.msra.mxu1 %v6769_v3  ;;  %v1392_v3 = vld [vmem:[#allocation5] sm:$0xff] }
  0x86   : > { %5929 = vmatprep.mubr.f32.mxu0 %v6838_v37  ;;  %6005 = vmatprep.subr.mxu1 %v6771_v4 }
  0x87   : > { %5955 = vmatmul.mubr.f32.gmra.mxu1 %v387_v36 }
  0x88   : > { %5957 = vmatprep.mubr.f32.mxu1 %v397_v47  ;;  %6006 = vmatpush3.msra.mxu1 %v6771_v4  ;;  %v1395_v4 = vsel %vm239_vm0, %v1392_v3, 0 }
  0x89   : > { %5930 = vmatmul.mubr.f32.gmra.mxu0 %v6841_v38 }
  0x8a   : > { %5932 = vmatprep.mubr.f32.mxu0 %v6877_v6 }
  0x8b   : > { %5958 = vmatmul.mubr.f32.gmra.mxu1 %v407_v48 }
  0x8c   : > { %5960 = vmatprep.mubr.f32.mxu1 %v417_v14 }
  0x8d   : > { %5933 = vmatmul.mubr.f32.gmra.mxu0 %v6883_v8 }
  0x8e   : > { %5935 = vmatprep.mubr.f32.mxu0 %v6895_v21 }
  0x8f   : > { %5961 = vmatmul.mubr.f32.gmra.mxu1 %v427_v33 }
  0x90   : > { %5963 = vmatprep.mubr.f32.mxu1 %v437_v41 }
  0x91   : > { %5936 = vmatmul.mubr.f32.gmra.mxu0 %v6903_v35 }
  0x92   : > { %5938 = vmatprep.mubr.f32.mxu0 %v6906_v15 }
  0x93   : > { %5964 = vmatmul.mubr.f32.gmra.mxu1 %v447_v45 }
  0x94   : > { %5966 = vmatprep.mubr.f32.mxu1 %v457_v46 }
  0x95   : > { %5939 = vmatmul.mubr.f32.gmra.mxu0 %v6916_v42 }
  0x96   : > { %5941 = vmatprep.mubr.f32.mxu0 %v6927_v49 }
  0x97   : > { %5967 = vmatmul.mubr.f32.gmra.mxu1 %v467_v52 }
  0x98   : > { %5969 = vmatprep.mubr.f32.mxu1 %v477_v60 }
  0x99   : > { %5942 = vmatmul.mubr.f32.gmra.mxu0 %v6949_v62 }
  0x9a   : > { %5944 = vmatprep.mubr.f32.mxu0 %v6964_v13 }
  0x9b   : > { %5970 = vmatmul.mubr.f32.gmra.mxu1 %v487_v12 }
  0x9c   : > { %5972 = vmatprep.mubr.f32.mxu1 %v497_v44 }
  0x9d   : > { %5945 = vmatmul.mubr.f32.gmra.mxu0 %v6974_v50 }
  0x9e   : > { %5979 = vmatprep.mubr.f32.mxu0 %v6777_v9 }
  0x9f   : > { %5973 = vmatmul.mubr.f32.gmra.mxu1 %v507_v54 }
  0xa0   : > { %6007 = vmatprep.mubr.f32.mxu1 %v6777_v9  ;;  %v7073_v9 = vand.u32 4294901760, %v1395_v4 }
  0xa1   : > { %5980 = vmatmul.mubr.f32.vlgmr.msra.gmra.mxu0 %v6788_v16 }
  0xa2   : > { %5982 = vmatprep.mubr.f32.mxu0 %v6793_v18 }
  0xa3   : > { %6008 = vmatmul.mubr.f32.vlgmr.msra.gmra.mxu1 %v6788_v16  ;;  %v7076_v16 = vsub.f32 %v1395_v4, %v7073_v9 }
  0xa4   : > { %6010 = vmatprep.mubr.f32.mxu1 %v6793_v18 }
  0xa5   : > { %5983 = vmatmul.mubr.f32.gmra.mxu0 %v6800_v20  ;;  %v7080_v18 = vand.u32 4294901760, %v7076_v16 }
  0xa6   : > { %5985 = vmatprep.mubr.f32.mxu0 %v6822_v29 }
  0xa7   : > { %6011 = vmatmul.mubr.f32.gmra.mxu1 %v6800_v20  ;;  %v1470_v19 = vsub.f32 %v7076_v16, %v7080_v18 }
  0xa8   : > { %6013 = vmatprep.mubr.f32.mxu1 %v6822_v29 }
  0xa9   : > { %5986 = vmatmul.mubr.f32.gmra.mxu0 %v6824_v30  ;;  %v7084_v20 = vand.u32 4294901760, %v1470_v19 }
  0xaa   : > { %5988 = vmatprep.mubr.f32.mxu0 %v6867_v59 }
  0xab   : > { %6014 = vmatmul.mubr.f32.gmra.mxu1 %v6824_v30 }
  0xac   : > { %6016 = vmatprep.mubr.f32.mxu1 %v6867_v59 }
  0xad   : > { %5989 = vmatmul.mubr.f32.gmra.mxu0 %v6870_v61 }
  0xae   : > { %5991 = vmatprep.mubr.f32.mxu0 %v6879_v7 }
  0xaf   : > { %6017 = vmatmul.mubr.f32.gmra.mxu1 %v6870_v61 }
  0xb0   : > { %6019 = vmatprep.mubr.f32.mxu1 %v6879_v7 }
  0xb1   : > { %5992 = vmatmul.mubr.f32.gmra.mxu0 %v6885_v10 }
  0xb2   : > { %5994 = vmatprep.mubr.f32.mxu0 %v6887_v11 }
  0xb3   : > { %6020 = vmatmul.mubr.f32.gmra.mxu1 %v6885_v10 }
  0xb4   : > { %6022 = vmatprep.mubr.f32.mxu1 %v6887_v11 }
  0xb5   : > { %5995 = vmatmul.mubr.f32.gmra.mxu0 %v6897_v22 }
  0xb6   : > { %5997 = vmatprep.mubr.f32.mxu0 %v6908_v39 }
  0xb7   : > { %6023 = vmatmul.mubr.f32.gmra.mxu1 %v6897_v22 }
  0xb8   : > { %6025 = vmatprep.mubr.f32.mxu1 %v6908_v39 }
  0xb9   : > { %5998 = vmatmul.mubr.f32.gmra.mxu0 %v6936_v53 }
  0xba   : > { %6000 = vmatprep.mubr.f32.mxu0 %v6954_v0 }
  0xbb   : > { %6026 = vmatmul.mubr.f32.gmra.mxu1 %v6936_v53 }
  0xbc   : > { %6028 = vmatprep.mubr.f32.mxu1 %v6954_v0 }
  0xbd   : > { %6001 = vmatmul.mubr.f32.gmra.mxu0 %v6966_v31 }
  0xbe   : > { %6035 = vmatprep.mubr.f32.mxu0 %v7084_v20 }
  0xbf   : > { %6029 = vmatmul.mubr.f32.gmra.mxu1 %v6966_v31 }
  0xc0   : > { %6042 = vmatprep.mubr.f32.mxu1 %v7073_v9 }
 0x121   : > { %v7087_v23 = vpop.f32.mrf.mxu0 }
 0x123   : > { %v7089_v24 = vpop.f32.mrf.mxu0  ;;  %v7091_v25 = vpop.f32.mrf.mxu1 }
 0x125   : > { %v5872_v26 = vpop.f32.mrf.mxu0  ;;  %v7093_v27 = vpop.f32.mrf.mxu1 }
 0x127   : > { %v381_v28 = vpop.f32.mrf.mxu0  ;;  %v5900_v29 = vpop.f32.mrf.mxu1 }
 0x128   : > { %v7095_v30 = vadd.f32 %v5900_v29, %v5872_v26 }
 0x129   : > { %v5875_v32 = vpop.f32.mrf.mxu0  ;;  %v604_v34 = vpop.f32.mrf.mxu1 }
 0x12a   : > { %v7097_v36 = vadd.f32 %v604_v34, %v381_v28 }
 0x12b   : > { %v401_v37 = vpop.f32.mrf.mxu0  ;;  %v5903_v38 = vpop.f32.mrf.mxu1 }
 0x12c   : > { %v7099_v47 = vadd.f32 %v5903_v38, %v5875_v32  ;;  %v1393_v38 = vld [vmem:[#allocation5 + $0x8] sm:$0xff] }
 0x12d   : > { %v5878_v48 = vpop.f32.mrf.mxu0  ;;  %v616_v59 = vpop.f32.mrf.mxu1 }
 0x12e   : > { %v7101_v61 = vadd.f32 %v616_v59, %v401_v37 }
 0x12f   : > { %v421_v6 = vpop.f32.mrf.mxu0  ;;  %v5906_v7 = vpop.f32.mrf.mxu1 }
 0x130   : > { %v635_v8 = vadd.f32 %v5906_v7, %v5878_v48 }
 0x131   : > { %v5881_v10 = vpop.f32.mrf.mxu0  ;;  %v628_v11 = vpop.f32.mrf.mxu1 }
 0x132   : > { %v629_v14 = vadd.f32 %v628_v11, %v421_v6 }
 0x133   : > { %v441_v21 = vpop.f32.mrf.mxu0  ;;  %v5909_v22 = vpop.f32.mrf.mxu1 }
 0x134   : > { %v647_v33 = vadd.f32 %v5909_v22, %v5881_v10 }
 0x135   : > { %v5884_v35 = vpop.f32.mrf.mxu0  ;;  %v640_v15 = vpop.f32.mrf.mxu1 }
 0x136   : > { %v641_v39 = vadd.f32 %v640_v15, %v441_v21  ;;  %v1398_v21 = vsel %vm239_vm0, %v1393_v38, 0 }
 0x137   : > { %v461_v41 = vpop.f32.mrf.mxu0  ;;  %v5912_v42 = vpop.f32.mrf.mxu1 }
 0x138   : > { %v659_v45 = vadd.f32 %v5912_v42, %v5884_v35  ;;  %v7126_v42 = vand.u32 4294901760, %v1398_v21 }
 0x139   : > { %v5887_v46 = vpop.f32.mrf.mxu0  ;;  %v652_v49 = vpop.f32.mrf.mxu1 }
 0x13a   : > { %v653_v52 = vadd.f32 %v652_v49, %v461_v41 }
 0x13b   : > { %v481_v53 = vpop.f32.mrf.mxu0  ;;  %v5915_v60 = vpop.f32.mrf.mxu1 }
 0x13c   : > { %v671_v62 = vadd.f32 %v5915_v60, %v5887_v46 }
 0x13d   : > { %v5890_v0 = vpop.f32.mrf.mxu0  ;;  %v664_v2 = vpop.f32.mrf.mxu1 }
 0x13e   : > { %v665_v5 = vadd.f32 %v664_v2, %v481_v53 }
 0x13f   : > { %v501_v12 = vpop.f32.mrf.mxu0  ;;  %v5918_v13 = vpop.f32.mrf.mxu1 }
 0x140   : > { %v683_v31 = vadd.f32 %v5918_v13, %v5890_v0  ;;  %v593_v13 = vadd.f32 %v7093_v27, %v7089_v24 }
 0x141   : > { %v676_v40 = vpop.f32.mrf.mxu1  ;;  %v5925_v43 = vpop.f32.mrf.mxu0 }
 0x142   : > { %v677_v44 = vadd.f32 %v676_v40, %v501_v12 }
 0x143   : > { %v758_v50 = vpop.f32.mrf.mxu0  ;;  %v5953_v17 = vpop.f32.mrf.mxu1 }
 0x145   : > { %v5928_v51 = vpop.f32.mrf.mxu0  ;;  %v938_v54 = vpop.f32.mrf.mxu1 }
 0x146   : > { %v780_v38 = vadd.f32 %v5928_v51, %v7095_v30 }
 0x147   : > { %v7103_v55 = vpop.f32.mrf.mxu0  ;;  %v7105_v56 = vpop.f32.mrf.mxu1 }
 0x149   : > { %v7107_v57 = vpop.f32.mrf.mxu0  ;;  %v7109_v58 = vpop.f32.mrf.mxu1 }
 0x14b   : > { %v7111_v63 = vpop.f32.mrf.mxu0  ;;  %v7113_v1 = vpop.f32.mrf.mxu1 }
 0x14d   : > { %v5934_v3 = vpop.f32.mrf.mxu0  ;;  %v7115_v4 = vpop.f32.mrf.mxu1 }
 0x14e   : > { %v808_v19 = vadd.f32 %v5934_v3, %v635_v8 }
 0x14f   : > { %v800_v26 = vpop.f32.mrf.mxu0  ;;  %v5962_v28 = vpop.f32.mrf.mxu1 }
 0x150   : > { %v801_v29 = vadd.f32 %v800_v26, %v629_v14  ;;  %v7117_v32 = vadd.f32 %v5962_v28, %v808_v19  ;;  %v759_v28 = vadd.f32 %v758_v50, %v593_v13 }
 0x151   : > { %v5937_v34 = vpop.f32.mrf.mxu0  ;;  %v986_v37 = vpop.f32.mrf.mxu1 }
 0x152   : > { %v822_v48 = vadd.f32 %v5937_v34, %v647_v33  ;;  %v7119_v59 = vadd.f32 %v986_v37, %v801_v29 }
 0x153   : > { %v814_v6 = vpop.f32.mrf.mxu0  ;;  %v5965_v7 = vpop.f32.mrf.mxu1 }
 0x154   : > { %v815_v10 = vadd.f32 %v814_v6, %v641_v39  ;;  %v7121_v11 = vadd.f32 %v5965_v7, %v822_v48  ;;  %v599_v39 = vadd.f32 %v7091_v25, %v7087_v23 }
 0x155   : > { %v5940_v22 = vpop.f32.mrf.mxu0  ;;  %v1002_v8 = vpop.f32.mrf.mxu1 }
 0x156   : > { %v836_v35 = vadd.f32 %v5940_v22, %v659_v45  ;;  %v7124_v15 = vadd.f32 %v1002_v8, %v815_v10  ;;  %v7135_v45 = vsub.f32 %v1398_v21, %v7126_v42  ;;  %v766_v40 = vadd.f32 %v5925_v43, %v599_v39 }
 0x157   : > { %v828_v14 = vpop.f32.mrf.mxu0  ;;  %v5968_v41 = vpop.f32.mrf.mxu1  ;;  %v939_v43 = vadd.f32 %v938_v54, %v759_v28  ;;  %v773_v21 = vadd.f32 %v7103_v55, %v7097_v36  ;;  %v794_v28 = vadd.f32 %v7107_v57, %v7099_v47 }
 0x158   : > { %v829_v46 = vadd.f32 %v828_v14, %v653_v52  ;;  %v7128_v33 = vadd.f32 %v5968_v41, %v836_v35  ;;  %v7144_v34 = vand.u32 4294901760, %v7135_v45  ;;  %v947_v37 = vadd.f32 %v5953_v17, %v766_v40 }
 0x159   : > { %v5943_v49 = vpop.f32.mrf.mxu0  ;;  %v1018_v53 = vpop.f32.mrf.mxu1  ;;  %v963_v17 = vadd.f32 %v7105_v56, %v780_v38  ;;  %v979_v47 = vadd.f32 %v7113_v1, %v794_v28 }
 0x15a   : > { %v850_v60 = vadd.f32 %v5943_v49, %v671_v62  ;;  %v7132_v0 = vadd.f32 %v1018_v53, %v829_v46  ;;  %v1480_v10 = vsub.f32 %v7135_v45, %v7144_v34  ;;  %v955_v46 = vadd.f32 %v7109_v58, %v773_v21 }
 0x15b   : > { %v842_v2 = vpop.f32.mrf.mxu0  ;;  %v5971_v12 = vpop.f32.mrf.mxu1 }
 0x15c   : > { %v843_v52 = vadd.f32 %v842_v2, %v665_v5  ;;  %v7139_v3 = vadd.f32 %v5971_v12, %v850_v60  ;;  %v7163_v36 = vand.u32 4294901760, %v1480_v10 }
 0x15d   : > { %v5946_v19 = vpop.f32.mrf.mxu0  ;;  %v1034_v26 = vpop.f32.mrf.mxu1 }
 0x15e   : > { %v864_v29 = vadd.f32 %v5946_v19, %v683_v31  ;;  %v7141_v23 = vadd.f32 %v1034_v26, %v843_v52 }
 0x15f   : > { %v856_v25 = vpop.f32.mrf.mxu0  ;;  %v5974_v62 = vpop.f32.mrf.mxu1 }
 0x160   : > { %v857_v48 = vadd.f32 %v856_v25, %v677_v44  ;;  %v7147_v24 = vadd.f32 %v5974_v62, %v864_v29 }
 0x161   : > { %v1050_v27 = vpop.f32.mrf.mxu1  ;;  %v5981_v5 = vpop.f32.mrf.mxu0 }
 0x162   : > { %v7149_v6 = vadd.f32 %v1050_v27, %v857_v48  ;;  %v1142_v50 = vadd.f32 %v5981_v5, %v947_v37  ;;  %v787_v37 = vadd.f32 %v7111_v63, %v7101_v61 }
 0x163   : > { %v1135_v31 = vpop.f32.mrf.mxu0  ;;  %v6009_v7 = vpop.f32.mrf.mxu1 }
 0x164   : > { %v1136_v30 = vadd.f32 %v1135_v31, %v939_v43  ;;  %v1305_v44 = vadd.f32 %v6009_v7, %v1142_v50  ;;  %v971_v63 = vadd.f32 %v7115_v4, %v787_v37 }
 0x165   : > { %v5984_v51 = vpop.f32.mrf.mxu0  ;;  %v1298_v22 = vpop.f32.mrf.mxu1 }
 0x166   : > { %v7156_v8 = vand.u32 4294901760, %v1305_v44  ;;  %v1154_v54 = vadd.f32 %v5984_v51, %v963_v17  ;;  %v1299_v35 = vadd.f32 %v1298_v22, %v1136_v30 }
 0x167   : > { %v1147_v14 = vpop.f32.mrf.mxu0  ;;  %v6012_v41 = vpop.f32.mrf.mxu1 }
 0x168   : > { %v1517_v49 = vsub.f32 %v1305_v44, %v7156_v8  ;;  %v7160_v53 = vand.u32 4294901760, %v1299_v35  ;;  %6031 = vmatprep.subr.mxu0 %v7156_v8  ;;  %v1148_v56 = vadd.f32 %v1147_v14, %v955_v46  ;;  %v1317_v39 = vadd.f32 %v6012_v41, %v1154_v54 }
 0x169   : > { %6032 = vmatpush3.msra.mxu0 %v7156_v8  ;;  %v1310_v60 = vpop.f32.mrf.mxu1  ;;  %v5987_v62 = vpop.f32.mrf.mxu0 }
 0x16a   : > { %v1524_v55 = vsub.f32 %v1299_v35, %v7160_v53  ;;  %6033 = vmatprep.subr.mxu0 %v7160_v53  ;;  %v1518_v58 = vand.u32 4294901760, %v1517_v49  ;;  %v7171_v13 = vand.u32 4294901760, %v1317_v39  ;;  %v1311_v40 = vadd.f32 %v1310_v60, %v1148_v56 }
 0x16b   : > { %6034 = vmatpush3.msra.mxu0 %v7160_v53  ;;  %v1166_v48 = vadd.f32 %v5987_v62, %v979_v47  ;;  %v1159_v27 = vpop.f32.mrf.mxu0  ;;  %v6015_v61 = vpop.f32.mrf.mxu1 }
 0x16c   : > { %6045 = vmatprep.subr.mxu0 %v1517_v49  ;;  %6036 = vmatmul.mubr.f32.vlgmr.msra.gmra.mxu0 %v7163_v36  ;;  %v1519_v2 = vsub.f32 %v1517_v49, %v1518_v58  ;;  %v1525_v12 = vand.u32 4294901760, %v1524_v55  ;;  %v2019_v29 = vsub.f32 %v1317_v39, %v7171_v13  ;;  %v7177_v25 = vand.u32 4294901760, %v1311_v40 }
 0x16d   : > { %6046 = vmatpush3.msra.mxu0 %v1517_v49  ;;  %6049 = vmatprep.mubr.f32.mxu0 %v7076_v16  ;;  %v1160_v43 = vadd.f32 %v1159_v27, %v971_v63  ;;  %v1329_v50 = vadd.f32 %v6015_v61, %v1166_v48  ;;  %v1322_v31 = vpop.f32.mrf.mxu1  ;;  %v5990_v51 = vpop.f32.mrf.mxu0 }
 0x16e   : > { %6047 = vmatprep.subr.mxu0 %v1524_v55  ;;  %v1520_v52 = vand.u32 4294901760, %v1519_v2  ;;  %v1526_v19 = vsub.f32 %v1524_v55, %v1525_v12  ;;  %v2026_v57 = vsub.f32 %v1311_v40, %v7177_v25  ;;  %v2020_v38 = vand.u32 4294901760, %v2019_v29 }
 0x16f   : > { %6048 = vmatpush3.msra.mxu0 %v1524_v55  ;;  %v7203_v10 = vand.u32 4294901760, %v1329_v50  ;;  %v1323_v21 = vadd.f32 %v1322_v31, %v1160_v43  ;;  %v1178_v54 = vadd.f32 %v5990_v51, %v7117_v32  ;;  %v1171_v35 = vpop.f32.mrf.mxu0  ;;  %v6018_v14 = vpop.f32.mrf.mxu1 }
 0x170   : > { %6059 = vmatprep.subr.mxu0 %v1518_v58  ;;  %6050 = vmatmul.mubr.f32.vlgmr.msra.gmra.mxu0 %v7135_v45  ;;  %v1527_v26 = vand.u32 4294901760, %v1526_v19  ;;  %v2021_v1 = vsub.f32 %v2019_v29, %v2020_v38  ;;  %v2027_v5 = vand.u32 4294901760, %v2026_v57  ;;  %v1172_v32 = vadd.f32 %v1171_v35, %v7119_v59 }
 0x171   : > { %6038 = vmatprep.subr.mxu1 %v1520_v52  ;;  %6060 = vmatpush3.msra.mxu0 %v1518_v58  ;;  %v2521_v30 = vsub.f32 %v1329_v50, %v7203_v10  ;;  %v7210_v44 = vand.u32 4294901760, %v1323_v21  ;;  %v1341_v49 = vadd.f32 %v6018_v14, %v1178_v54 }
 0x172   : > { %6039 = vmatpush3.msra.mxu1 %v1520_v52  ;;  %6061 = vmatprep.subr.mxu0 %v1525_v12  ;;  %v2022_v4 = vand.u32 4294901760, %v2021_v1  ;;  %v2028_v7 = vsub.f32 %v2026_v57, %v2027_v5 }
 0x173   : > { %6040 = vmatprep.subr.mxu1 %v1527_v26  ;;  %6062 = vmatpush3.msra.mxu0 %v1525_v12  ;;  %v2528_v22 = vsub.f32 %v1323_v21, %v7210_v44  ;;  %v7235_v39 = vand.u32 4294901760, %v1341_v49  ;;  %v5993_v12 = vpop.f32.mrf.mxu0 }
 0x174   : > { %6041 = vmatpush3.msra.mxu1 %v1527_v26  ;;  %6063 = vmatprep.mubr.f32.mxu0 %v7073_v9  ;;  %v2029_v17 = vand.u32 4294901760, %v2028_v7  ;;  %v1190_v52 = vadd.f32 %v5993_v12, %v7121_v11 }
 0x175   : > { %6052 = vmatprep.subr.mxu1 %v7156_v8  ;;  %6073 = vmatprep.subr.mxu0 %v7171_v13  ;;  %v2529_v46 = vand.u32 4294901760, %v2528_v22  ;;  %v3023_v58 = vsub.f32 %v1341_v49, %v7235_v39  ;;  %v1183_v19 = vpop.f32.mrf.mxu0 }
 0x176   : > { %6043 = vmatmul.mubr.f32.vlgmr.msra.gmra.mxu1 %v7126_v42  ;;  %6064 = vmatmul.mubr.f32.vlgmr.msra.gmra.mxu0 %v7126_v42  ;;  %v1184_v11 = vadd.f32 %v1183_v19, %v7124_v15 }
 0x177   : > { %6053 = vmatpush3.msra.mxu1 %v7156_v8  ;;  %6074 = vmatpush3.msra.mxu0 %v7171_v13  ;;  %v2530_v56 = vsub.f32 %v2528_v22, %v2529_v46  ;;  %v3024_v40 = vand.u32 4294901760, %v3023_v58  ;;  %v5996_v61 = vpop.f32.mrf.mxu0 }
 0x178   : > { %6054 = vmatprep.subr.mxu1 %v7160_v53  ;;  %6075 = vmatprep.subr.mxu0 %v7177_v25 }
 0x179   : > { %6055 = vmatpush3.msra.mxu1 %v7160_v53  ;;  %6076 = vmatpush3.msra.mxu0 %v7177_v25  ;;  %v2531_v60 = vand.u32 4294901760, %v2530_v56  ;;  %v3025_v28 = vsub.f32 %v3023_v58, %v3024_v40  ;;  %v1195_v43 = vpop.f32.mrf.mxu0 }
 0x17a   : > { %6056 = vmatprep.mubr.f32.mxu1 %v7080_v18  ;;  %6066 = vmatprep.subr.mxu1 %v7156_v8 }
 0x17b   : > { %6077 = vmatprep.mubr.f32.mxu0 %v7084_v20  ;;  %6087 = vmatprep.subr.mxu0 %v2019_v29  ;;  %v3026_v37 = vand.u32 4294901760, %v3025_v28 }
 0x17c   : > { %6057 = vmatmul.mubr.f32.vlgmr.msra.gmra.mxu1 %v7144_v34  ;;  %6078 = vmatmul.mubr.f32.vlgmr.msra.gmra.mxu0 %v7163_v36 }
 0x17d   : > { %6067 = vmatpush3.msra.mxu1 %v7156_v8  ;;  %6088 = vmatpush3.msra.mxu0 %v2019_v29  ;;  %v2522_v8 = vand.u32 4294901760, %v2521_v30 }
 0x17e   : > { %6068 = vmatprep.subr.mxu1 %v7160_v53  ;;  %6089 = vmatprep.subr.mxu0 %v2026_v57 }
 0x17f   : > { %6069 = vmatpush3.msra.mxu1 %v7160_v53  ;;  %6090 = vmatpush3.msra.mxu0 %v2026_v57  ;;  %v2523_v41 = vsub.f32 %v2521_v30, %v2522_v8  ;;  %v1334_v53 = vpop.f32.mrf.mxu1 }
 0x180   : > { %6070 = vmatprep.mubr.f32.mxu1 %v7073_v9  ;;  %6080 = vmatprep.subr.mxu1 %v2022_v4  ;;  %v1335_v59 = vadd.f32 %v1334_v53, %v1172_v32 }
 0x181   : > { %6091 = vmatprep.mubr.f32.mxu0 %v7076_v16  ;;  %6101 = vmatprep.subr.mxu0 %v2020_v38  ;;  %v2524_v55 = vand.u32 4294901760, %v2523_v41  ;;  %v6021_v26 = vpop.f32.mrf.mxu1 }
 0x182   : > { %6071 = vmatmul.mubr.f32.vlgmr.msra.gmra.mxu1 %v7126_v42  ;;  %6092 = vmatmul.mubr.f32.vlgmr.msra.gmra.mxu0 %v7135_v45  ;;  %v7242_v2 = vand.u32 4294901760, %v1335_v59 }
 0x183   : > { %6081 = vmatpush3.msra.mxu1 %v2022_v4  ;;  %6102 = vmatpush3.msra.mxu0 %v2020_v38  ;;  %v1346_v62 = vpop.f32.mrf.mxu1 }
 0x184   : > { %6082 = vmatprep.subr.mxu1 %v2029_v17  ;;  %6103 = vmatprep.subr.mxu0 %v2027_v5  ;;  %v1347_v15 = vadd.f32 %v1346_v62, %v1184_v11 }
 0x185   : > { %6083 = vmatpush3.msra.mxu1 %v2029_v17  ;;  %6104 = vmatpush3.msra.mxu0 %v2027_v5  ;;  %v1202_v5 = vadd.f32 %v5996_v61, %v7128_v33  ;;  %v6024_v50 = vpop.f32.mrf.mxu1  ;;  %v1196_v33 = vadd.f32 %v1195_v43, %v7132_v0 }
 0x186   : > { %6084 = vmatprep.mubr.f32.mxu1 %v7073_v9  ;;  %6094 = vmatprep.subr.mxu1 %v7171_v13  ;;  %v7274_v27 = vand.u32 4294901760, %v1347_v15 }
 0x187   : > { %6105 = vmatprep.mubr.f32.mxu0 %v7073_v9  ;;  %6115 = vmatprep.subr.mxu0 %v7203_v10  ;;  %v1365_v7 = vadd.f32 %v6024_v50, %v1202_v5 }
 0x188   : > { %6085 = vmatmul.mubr.f32.vlgmr.msra.gmra.mxu1 %v7126_v42  ;;  %6106 = vmatmul.mubr.f32.vlgmr.msra.gmra.mxu0 %v7126_v42  ;;  %v3532_v63 = vsub.f32 %v1347_v15, %v7274_v27 }
 0x189   : > { %6095 = vmatpush3.msra.mxu1 %v7171_v13  ;;  %6116 = vmatpush3.msra.mxu0 %v7203_v10 }
 0x18a   : > { %6096 = vmatprep.subr.mxu1 %v7177_v25  ;;  %6117 = vmatprep.subr.mxu0 %v7210_v44  ;;  %v3533_v4 = vand.u32 4294901760, %v3532_v63 }
 0x18b   : > { %6097 = vmatpush3.msra.mxu1 %v7177_v25  ;;  %6118 = vmatpush3.msra.mxu0 %v7210_v44 }
 0x18c   : > { %6098 = vmatprep.mubr.f32.mxu1 %v7080_v18  ;;  %6108 = vmatprep.subr.mxu1 %v7171_v13  ;;  %v3534_v17 = vsub.f32 %v3532_v63, %v3533_v4 }
 0x18d   : > { %6119 = vmatprep.mubr.f32.mxu0 %v7084_v20  ;;  %6129 = vmatprep.subr.mxu0 %v2521_v30 }
 0x18e   : > { %6099 = vmatmul.mubr.f32.vlgmr.msra.gmra.mxu1 %v7144_v34  ;;  %6120 = vmatmul.mubr.f32.vlgmr.msra.gmra.mxu0 %v7163_v36 }
 0x18f   : > { %6109 = vmatpush3.msra.mxu1 %v7171_v13  ;;  %6130 = vmatpush3.msra.mxu0 %v2521_v30  ;;  %v3030_v13 = vsub.f32 %v1335_v59, %v7242_v2  ;;  %v7299_v30 = vand.u32 4294901760, %v1365_v7 }
 0x190   : > { %6110 = vmatprep.subr.mxu1 %v7177_v25  ;;  %6131 = vmatprep.subr.mxu0 %v2528_v22 }
 0x191   : > { %6111 = vmatpush3.msra.mxu1 %v7177_v25  ;;  %6132 = vmatpush3.msra.mxu0 %v2528_v22  ;;  %v3031_v29 = vand.u32 4294901760, %v3030_v13  ;;  %v1353_v25 = vadd.f32 %v6021_v26, %v1190_v52  ;;  %v4027_v51 = vsub.f32 %v1365_v7, %v7299_v30 }
 0x192   : > { %6112 = vmatprep.mubr.f32.mxu1 %v7073_v9  ;;  %6122 = vmatprep.subr.mxu1 %v2524_v55 }
 0x193   : > { %6133 = vmatprep.mubr.f32.mxu0 %v7076_v16  ;;  %6143 = vmatprep.subr.mxu0 %v2522_v8  ;;  %v3032_v47 = vsub.f32 %v3030_v13, %v3031_v29  ;;  %v7267_v57 = vand.u32 4294901760, %v1353_v25  ;;  %v4028_v35 = vand.u32 4294901760, %v4027_v51 }
 0x194   : > { %6113 = vmatmul.mubr.f32.vlgmr.msra.gmra.mxu1 %v7126_v42  ;;  %6134 = vmatmul.mubr.f32.vlgmr.msra.gmra.mxu0 %v7135_v45 }
 0x195   : > { %6123 = vmatpush3.msra.mxu1 %v2524_v55  ;;  %6144 = vmatpush3.msra.mxu0 %v2522_v8  ;;  %v3033_v38 = vand.u32 4294901760, %v3032_v47  ;;  %v3525_v48 = vsub.f32 %v1353_v25, %v7267_v57  ;;  %v5999_v8 = vpop.f32.mrf.mxu0  ;;  %v4029_v32 = vsub.f32 %v4027_v51, %v4028_v35 }
 0x196   : > { %6124 = vmatprep.subr.mxu1 %v2531_v60  ;;  %6145 = vmatprep.subr.mxu0 %v2529_v46  ;;  %v1214_v14 = vadd.f32 %v5999_v8, %v7139_v3 }
 0x197   : > { %6125 = vmatpush3.msra.mxu1 %v2531_v60  ;;  %6146 = vmatpush3.msra.mxu0 %v2529_v46  ;;  %v3526_v1 = vand.u32 4294901760, %v3525_v48  ;;  %v1207_v41 = vpop.f32.mrf.mxu0  ;;  %v4030_v56 = vand.u32 4294901760, %v4029_v32 }
 0x198   : > { %6126 = vmatprep.mubr.f32.mxu1 %v7073_v9  ;;  %6136 = vmatprep.subr.mxu1 %v7203_v10  ;;  %v1208_v3 = vadd.f32 %v1207_v41, %v7141_v23 }
 0x199   : > { %6147 = vmatprep.mubr.f32.mxu0 %v7073_v9  ;;  %6157 = vmatprep.subr.mxu0 %v7235_v39  ;;  %v3527_v31 = vsub.f32 %v3525_v48, %v3526_v1  ;;  %v6002_v12 = vpop.f32.mrf.mxu0 }
 0x19a   : > { %6127 = vmatmul.mubr.f32.vlgmr.msra.gmra.mxu1 %v7126_v42  ;;  %6148 = vmatmul.mubr.f32.vlgmr.msra.gmra.mxu0 %v7126_v42  ;;  %v1226_v52 = vadd.f32 %v6002_v12, %v7147_v24 }
 0x19b   : > { %6137 = vmatpush3.msra.mxu1 %v7203_v10  ;;  %6158 = vmatpush3.msra.mxu0 %v7235_v39  ;;  %v3528_v21 = vand.u32 4294901760, %v3527_v31  ;;  %v1219_v19 = vpop.f32.mrf.mxu0 }
 0x19c   : > { %6138 = vmatprep.subr.mxu1 %v7210_v44  ;;  %6159 = vmatprep.subr.mxu0 %v7242_v2  ;;  %v1220_v24 = vadd.f32 %v1219_v19, %v7149_v6 }
 0x19d   : > { %6139 = vmatpush3.msra.mxu1 %v7210_v44  ;;  %6160 = vmatpush3.msra.mxu0 %v7242_v2 }
 0x19e   : > { %6140 = vmatprep.mubr.f32.mxu1 %v7080_v18  ;;  %6150 = vmatprep.subr.mxu1 %v7203_v10 }
 0x19f   : > { %6161 = vmatprep.mubr.f32.mxu0 %v7084_v20  ;;  %6171 = vmatprep.subr.mxu0 %v3023_v58 }
 0x1a0   : > { %6141 = vmatmul.mubr.f32.vlgmr.msra.gmra.mxu1 %v7144_v34  ;;  %6162 = vmatmul.mubr.f32.vlgmr.msra.gmra.mxu0 %v7163_v36 }
 0x1a1   : > { %6151 = vmatpush3.msra.mxu1 %v7203_v10  ;;  %6172 = vmatpush3.msra.mxu0 %v3023_v58  ;;  %v1358_v10 = vpop.f32.mrf.mxu1 }
 0x1a2   : > { %6152 = vmatprep.subr.mxu1 %v7210_v44  ;;  %6173 = vmatprep.subr.mxu0 %v3030_v13  ;;  %v1359_v0 = vadd.f32 %v1358_v10, %v1196_v33 }
 0x1a3   : > { %6153 = vmatpush3.msra.mxu1 %v7210_v44  ;;  %6174 = vmatpush3.msra.mxu0 %v3030_v13  ;;  %v3535_v44 = vand.u32 4294901760, %v3534_v17  ;;  %v6027_v46 = vpop.f32.mrf.mxu1 }
 0x1a4   : > { %6154 = vmatprep.mubr.f32.mxu1 %v7073_v9  ;;  %6164 = vmatprep.subr.mxu1 %v3026_v37  ;;  %v7306_v22 = vand.u32 4294901760, %v1359_v0  ;;  %v1377_v53 = vadd.f32 %v6027_v46, %v1214_v14 }
 0x1a5   : > { %6175 = vmatprep.mubr.f32.mxu0 %v7076_v16  ;;  %6185 = vmatprep.subr.mxu0 %v3024_v40  ;;  %v1370_v55 = vpop.f32.mrf.mxu1 }
 0x1a6   : > { %6155 = vmatmul.mubr.f32.vlgmr.msra.gmra.mxu1 %v7126_v42  ;;  %6176 = vmatmul.mubr.f32.vlgmr.msra.gmra.mxu0 %v7135_v45  ;;  %v4034_v54 = vsub.f32 %v1359_v0, %v7306_v22  ;;  %v7331_v59 = vand.u32 4294901760, %v1377_v53  ;;  %v1371_v23 = vadd.f32 %v1370_v55, %v1208_v3 }
 0x1a7   : > { %6165 = vmatpush3.msra.mxu1 %v3026_v37  ;;  %6186 = vmatpush3.msra.mxu0 %v3024_v40  ;;  %v6030_v26 = vpop.f32.mrf.mxu1 }
 0x1a8   : > { %6166 = vmatprep.subr.mxu1 %v3033_v38  ;;  %6187 = vmatprep.subr.mxu0 %v3031_v29  ;;  %v4035_v49 = vand.u32 4294901760, %v4034_v54  ;;  %v4529_v58 = vsub.f32 %v1377_v53, %v7331_v59  ;;  %v1389_v11 = vadd.f32 %v6030_v26, %v1226_v52 }
 0x1a9   : > { %6167 = vmatpush3.msra.mxu1 %v3033_v38  ;;  %6188 = vmatpush3.msra.mxu0 %v3031_v29  ;;  %v1382_v25 = vpop.f32.mrf.mxu1 }
 0x1aa   : > { %6168 = vmatprep.mubr.f32.mxu1 %v7073_v9  ;;  %6178 = vmatprep.subr.mxu1 %v7235_v39  ;;  %v4530_v40 = vand.u32 4294901760, %v4529_v58  ;;  %v7363_v47 = vand.u32 4294901760, %v1389_v11  ;;  %v1383_v6 = vadd.f32 %v1382_v25, %v1220_v24 }
 0x1ab   : > { %6189 = vmatprep.mubr.f32.mxu0 %v7073_v9  ;;  %6199 = vmatprep.subr.mxu0 %v7267_v57 }
 0x1ac   : > { %6169 = vmatmul.mubr.f32.vlgmr.msra.gmra.mxu1 %v7126_v42  ;;  %6190 = vmatmul.mubr.f32.vlgmr.msra.gmra.mxu0 %v7126_v42  ;;  %v4531_v28 = vsub.f32 %v4529_v58, %v4530_v40  ;;  %v5031_v15 = vsub.f32 %v1389_v11, %v7363_v47  ;;  %v4946_v38 = vand.u32 4294901760, %v1383_v6 }
 0x1ad   : > { %6179 = vmatpush3.msra.mxu1 %v7235_v39  ;;  %6200 = vmatpush3.msra.mxu0 %v7267_v57 }
 0x1ae   : > { %6180 = vmatprep.subr.mxu1 %v7242_v2  ;;  %6201 = vmatprep.subr.mxu0 %v7274_v27  ;;  %v4532_v62 = vand.u32 4294901760, %v4531_v28 }
 0x1af   : > { %6181 = vmatpush3.msra.mxu1 %v7242_v2  ;;  %6202 = vmatpush3.msra.mxu0 %v7274_v27 }
 0x1b0   : > { %6182 = vmatprep.mubr.f32.mxu1 %v7080_v18  ;;  %6192 = vmatprep.subr.mxu1 %v7235_v39 }
 0x1b1   : > { %6203 = vmatprep.mubr.f32.mxu0 %v7084_v20  ;;  %6213 = vmatprep.subr.mxu0 %v3525_v48 }
 0x1b2   : > { %6183 = vmatmul.mubr.f32.vlgmr.msra.gmra.mxu1 %v7144_v34  ;;  %6204 = vmatmul.mubr.f32.vlgmr.msra.gmra.mxu0 %v7163_v36 }
 0x1b3   : > { %6193 = vmatpush3.msra.mxu1 %v7235_v39  ;;  %6214 = vmatpush3.msra.mxu0 %v3525_v48  ;;  %v4036_v39 = vsub.f32 %v4034_v54, %v4035_v49  ;;  %v5038_v48 = vsub.f32 %v1383_v6, %v4946_v38 }
 0x1b4   : > { %6194 = vmatprep.subr.mxu1 %v7242_v2  ;;  %6215 = vmatprep.subr.mxu0 %v3532_v63 }
 0x1b5   : > { %6195 = vmatpush3.msra.mxu1 %v7242_v2  ;;  %6216 = vmatpush3.msra.mxu0 %v3532_v63  ;;  %v4037_v60 = vand.u32 4294901760, %v4036_v39  ;;  %v7338_v2 = vand.u32 4294901760, %v1371_v23  ;;  %v5039_v63 = vand.u32 4294901760, %v5038_v48 }
 0x1b6   : > { %6196 = vmatprep.mubr.f32.mxu1 %v7073_v9  ;;  %6206 = vmatprep.subr.mxu1 %v3528_v21 }
 0x1b7   : > { %6217 = vmatprep.mubr.f32.mxu0 %v7076_v16  ;;  %6227 = vmatprep.subr.mxu0 %v3526_v1  ;;  %v4536_v13 = vsub.f32 %v1371_v23, %v7338_v2  ;;  %v5040_v5 = vsub.f32 %v5038_v48, %v5039_v63 }
 0x1b8   : > { %6197 = vmatmul.mubr.f32.vlgmr.msra.gmra.mxu1 %v7126_v42  ;;  %6218 = vmatmul.mubr.f32.vlgmr.msra.gmra.mxu0 %v7135_v45 }
 0x1b9   : > { %6207 = vmatpush3.msra.mxu1 %v3528_v21  ;;  %6228 = vmatpush3.msra.mxu0 %v3526_v1  ;;  %v4537_v29 = vand.u32 4294901760, %v4536_v13 }
 0x1ba   : > { %6208 = vmatprep.subr.mxu1 %v3535_v44  ;;  %6229 = vmatprep.subr.mxu0 %v3533_v4 }
 0x1bb   : > { %6209 = vmatpush3.msra.mxu1 %v3535_v44  ;;  %6230 = vmatpush3.msra.mxu0 %v3533_v4  ;;  %v4538_v37 = vsub.f32 %v4536_v13, %v4537_v29 }
 0x1bc   : > { %6210 = vmatprep.mubr.f32.mxu1 %v7073_v9  ;;  %6220 = vmatprep.subr.mxu1 %v7267_v57 }
 0x1bd   : > { %6231 = vmatprep.mubr.f32.mxu0 %v7073_v9  ;;  %6241 = vmatprep.subr.mxu0 %v7299_v30 }
 0x1be   : > { %6211 = vmatmul.mubr.f32.vlgmr.msra.gmra.mxu1 %v7126_v42  ;;  %6232 = vmatmul.mubr.f32.vlgmr.msra.gmra.mxu0 %v7126_v42 }
 0x1bf   : > { %6221 = vmatpush3.msra.mxu1 %v7267_v57  ;;  %6242 = vmatpush3.msra.mxu0 %v7299_v30 }
 0x1c0   : > { %6222 = vmatprep.subr.mxu1 %v7274_v27  ;;  %6243 = vmatprep.subr.mxu0 %v7306_v22 }
 0x1c1   : > { %6223 = vmatpush3.msra.mxu1 %v7274_v27  ;;  %6244 = vmatpush3.msra.mxu0 %v7306_v22 }
 0x1c2   : > { %6224 = vmatprep.mubr.f32.mxu1 %v7080_v18  ;;  %6234 = vmatprep.subr.mxu1 %v7267_v57 }
 0x1c3   : > { %6245 = vmatprep.mubr.f32.mxu0 %v7084_v20  ;;  %6255 = vmatprep.subr.mxu0 %v4027_v51 }
 0x1c4   : > { %6225 = vmatmul.mubr.f32.vlgmr.msra.gmra.mxu1 %v7144_v34  ;;  %6246 = vmatmul.mubr.f32.vlgmr.msra.gmra.mxu0 %v7163_v36 }
 0x1c5   : > { %6235 = vmatpush3.msra.mxu1 %v7267_v57  ;;  %6256 = vmatpush3.msra.mxu0 %v4027_v51  ;;  %v4539_v57 = vand.u32 4294901760, %v4538_v37 }
 0x1c6   : > { %6236 = vmatprep.subr.mxu1 %v7274_v27  ;;  %6257 = vmatprep.subr.mxu0 %v4034_v54 }
 0x1c7   : > { %6237 = vmatpush3.msra.mxu1 %v7274_v27  ;;  %6258 = vmatpush3.msra.mxu0 %v4034_v54  ;;  %v5032_v27 = vand.u32 4294901760, %v5031_v15 }
 0x1c8   : > { %6238 = vmatprep.mubr.f32.mxu1 %v7073_v9  ;;  %6248 = vmatprep.subr.mxu1 %v4030_v56 }
 0x1c9   : > { %6259 = vmatprep.mubr.f32.mxu0 %v7076_v16  ;;  %6269 = vmatprep.subr.mxu0 %v4028_v35  ;;  %v5033_v61 = vsub.f32 %v5031_v15, %v5032_v27 }
 0x1ca   : > { %6239 = vmatmul.mubr.f32.vlgmr.msra.gmra.mxu1 %v7126_v42  ;;  %6260 = vmatmul.mubr.f32.vlgmr.msra.gmra.mxu0 %v7135_v45 }
 0x1cb   : > { %6249 = vmatpush3.msra.mxu1 %v4030_v56  ;;  %6270 = vmatpush3.msra.mxu0 %v4028_v35  ;;  %v5034_v1 = vand.u32 4294901760, %v5033_v61 }
 0x1cc   : > { %6250 = vmatprep.subr.mxu1 %v4037_v60  ;;  %6271 = vmatprep.subr.mxu0 %v4035_v49 }
 0x1cd   : > { %6251 = vmatpush3.msra.mxu1 %v4037_v60  ;;  %6272 = vmatpush3.msra.mxu0 %v4035_v49 }
 0x1ce   : > { %6252 = vmatprep.mubr.f32.mxu1 %v7073_v9  ;;  %6262 = vmatprep.subr.mxu1 %v7299_v30 }
 0x1cf   : > { %6273 = vmatprep.mubr.f32.mxu0 %v7073_v9  ;;  %6283 = vmatprep.subr.mxu0 %v7331_v59 }
 0x1d0   : > { %6253 = vmatmul.mubr.f32.vlgmr.msra.gmra.mxu1 %v7126_v42  ;;  %6274 = vmatmul.mubr.f32.vlgmr.msra.gmra.mxu0 %v7126_v42 }
 0x1d1   : > { %6263 = vmatpush3.msra.mxu1 %v7299_v30  ;;  %6284 = vmatpush3.msra.mxu0 %v7331_v59 }
 0x1d2   : > { %6264 = vmatprep.subr.mxu1 %v7306_v22  ;;  %6285 = vmatprep.subr.mxu0 %v7338_v2 }
 0x1d3   : > { %6265 = vmatpush3.msra.mxu1 %v7306_v22  ;;  %6286 = vmatpush3.msra.mxu0 %v7338_v2 }
 0x1d4   : > { %6266 = vmatprep.mubr.f32.mxu1 %v7080_v18  ;;  %6276 = vmatprep.subr.mxu1 %v7299_v30 }
 0x1d5   : > { %6287 = vmatprep.mubr.f32.mxu0 %v7084_v20  ;;  %6297 = vmatprep.subr.mxu0 %v4529_v58 }
 0x1d6   : > { %6267 = vmatmul.mubr.f32.vlgmr.msra.gmra.mxu1 %v7144_v34  ;;  %6288 = vmatmul.mubr.f32.vlgmr.msra.gmra.mxu0 %v7163_v36 }
 0x1d7   : > { %6277 = vmatpush3.msra.mxu1 %v7299_v30  ;;  %6298 = vmatpush3.msra.mxu0 %v4529_v58 }
 0x1d8   : > { %6278 = vmatprep.subr.mxu1 %v7306_v22  ;;  %6299 = vmatprep.subr.mxu0 %v4536_v13 }
 0x1d9   : > { %6279 = vmatpush3.msra.mxu1 %v7306_v22  ;;  %6300 = vmatpush3.msra.mxu0 %v4536_v13 }
 0x1da   : > { %6280 = vmatprep.mubr.f32.mxu1 %v7073_v9  ;;  %6290 = vmatprep.subr.mxu1 %v4532_v62 }
 0x1db   : > { %6301 = vmatprep.mubr.f32.mxu0 %v7076_v16  ;;  %6311 = vmatprep.subr.mxu0 %v4530_v40 }
 0x1dc   : > { %6281 = vmatmul.mubr.f32.vlgmr.msra.gmra.mxu1 %v7126_v42  ;;  %6302 = vmatmul.mubr.f32.vlgmr.msra.gmra.mxu0 %v7135_v45 }
 0x1dd   : > { %6291 = vmatpush3.msra.mxu1 %v4532_v62  ;;  %6312 = vmatpush3.msra.mxu0 %v4530_v40 }
 0x1de   : > { %6292 = vmatprep.subr.mxu1 %v4539_v57  ;;  %6313 = vmatprep.subr.mxu0 %v4537_v29 }
 0x1df   : > { %6293 = vmatpush3.msra.mxu1 %v4539_v57  ;;  %6314 = vmatpush3.msra.mxu0 %v4537_v29 }
 0x1e0   : > { %6294 = vmatprep.mubr.f32.mxu1 %v7073_v9  ;;  %6304 = vmatprep.subr.mxu1 %v7331_v59 }
 0x1e1   : > { %6315 = vmatprep.mubr.f32.mxu0 %v7073_v9  ;;  %6325 = vmatprep.subr.mxu0 %v7363_v47 }
 0x1e2   : > { %6295 = vmatmul.mubr.f32.vlgmr.msra.gmra.mxu1 %v7126_v42  ;;  %6316 = vmatmul.mubr.f32.vlgmr.msra.gmra.mxu0 %v7126_v42 }
 0x1e3   : > { %6305 = vmatpush3.msra.mxu1 %v7331_v59  ;;  %6326 = vmatpush3.msra.mxu0 %v7363_v47 }
 0x1e4   : > { %6306 = vmatprep.subr.mxu1 %v7338_v2  ;;  %6327 = vmatprep.subr.mxu0 %v4946_v38 }
 0x1e5   : > { %6307 = vmatpush3.msra.mxu1 %v7338_v2  ;;  %6328 = vmatpush3.msra.mxu0 %v4946_v38 }
 0x1e6   : > { %6308 = vmatprep.mubr.f32.mxu1 %v7080_v18  ;;  %6318 = vmatprep.subr.mxu1 %v7331_v59 }
 0x1e7   : > { %6329 = vmatprep.mubr.f32.mxu0 %v7084_v20  ;;  %6339 = vmatprep.subr.mxu0 %v5031_v15  ;;  %v5041_v20 = vand.u32 4294901760, %v5040_v5 }
 0x1e8   : > { %6309 = vmatmul.mubr.f32.vlgmr.msra.gmra.mxu1 %v7144_v34  ;;  %6330 = vmatmul.mubr.f32.vlgmr.msra.gmra.mxu0 %v7163_v36 }
 0x1e9   : > { %6319 = vmatpush3.msra.mxu1 %v7331_v59  ;;  %6340 = vmatpush3.msra.mxu0 %v5031_v15 }
 0x1ea   : > { %6320 = vmatprep.subr.mxu1 %v7338_v2  ;;  %6341 = vmatprep.subr.mxu0 %v5038_v48 }
 0x1eb   : > { %6321 = vmatpush3.msra.mxu1 %v7338_v2  ;;  %6342 = vmatpush3.msra.mxu0 %v5038_v48 }
 0x1ec   : > { %6322 = vmatprep.mubr.f32.mxu1 %v7073_v9  ;;  %6332 = vmatprep.subr.mxu1 %v5034_v1 }
 0x1ed   : > { %6343 = vmatprep.mubr.f32.mxu0 %v7076_v16  ;;  %6353 = vmatprep.subr.mxu0 %v5032_v27 }
 0x1ee   : > { %6323 = vmatmul.mubr.f32.vlgmr.msra.gmra.mxu1 %v7126_v42  ;;  %6344 = vmatmul.mubr.f32.vlgmr.msra.gmra.mxu0 %v7135_v45 }
 0x1ef   : > { %6333 = vmatpush3.msra.mxu1 %v5034_v1  ;;  %6354 = vmatpush3.msra.mxu0 %v5032_v27 }
 0x1f0   : > { %6334 = vmatprep.subr.mxu1 %v5041_v20  ;;  %6355 = vmatprep.subr.mxu0 %v5039_v63 }
 0x1f1   : > { %6335 = vmatpush3.msra.mxu1 %v5041_v20  ;;  %6356 = vmatpush3.msra.mxu0 %v5039_v63 }
 0x1f2   : > { %6336 = vmatprep.mubr.f32.mxu1 %v7073_v9  ;;  %6346 = vmatprep.subr.mxu1 %v7363_v47 }
 0x1f3   : > { %6337 = vmatmul.mubr.f32.vlgmr.msra.gmra.mxu1 %v7126_v42  ;;  %6357 = vmatprep.mubr.f32.mxu0 %v7073_v9 }
 0x1f4   : > { %6347 = vmatpush3.msra.mxu1 %v7363_v47  ;;  %6350 = vmatprep.mubr.f32.mxu1 %v7080_v18 }
 0x1f5   : > { %6348 = vmatprep.subr.mxu1 %v4946_v38  ;;  %6358 = vmatmul.mubr.f32.vlgmr.msra.gmra.mxu0 %v7126_v42 }
 0x1f6   : > { %6349 = vmatpush3.msra.mxu1 %v4946_v38 }
 0x1f7   : > { %6360 = vmatprep.subr.mxu1 %v7363_v47  ;;  %6351 = vmatmul.mubr.f32.vlgmr.msra.gmra.mxu1 %v7144_v34 }
 0x1f8   : > { %6361 = vmatpush3.msra.mxu1 %v7363_v47  ;;  %6364 = vmatprep.mubr.f32.mxu1 %v7073_v9 }
 0x1f9   : > { %6362 = vmatprep.subr.mxu1 %v4946_v38 }
 0x1fa   : > { %6363 = vmatpush3.msra.mxu1 %v4946_v38 }
 0x1fb   : > { %6365 = vmatmul.mubr.f32.vlgmr.msra.gmra.mxu1 %v7126_v42 }
 0x22c   : > { %v6037_v16 = vpop.f32.mrf.mxu0 }
 0x22e   : > { %v1473_v45 = vpop.f32.mrf.mxu0 }
 0x230   : > { %v6051_v36 = vpop.f32.mrf.mxu0 }
 0x232   : > { %v1646_v18 = vpop.f32.mrf.mxu0 }
 0x236   : > { %v6044_v43 = vpop.f32.mrf.mxu1  ;;  %v6065_v50 = vpop.f32.mrf.mxu0 }
 0x237   : > { %v1571_v31 = vadd.f32 %v6044_v43, %v6037_v16 }
 0x238   : > { %v1564_v4 = vpop.f32.mrf.mxu1  ;;  %v1813_v33 = vpop.f32.mrf.mxu0 }
 0x239   : > { %v1565_v7 = vadd.f32 %v1564_v4, %v1473_v45  ;;  %v1654_v34 = vadd.f32 %v6051_v36, %v1571_v31 }
 0x23b   : > { %v1647_v10 = vadd.f32 %v1646_v18, %v1565_v7 }
 0x23c   : > { %v6058_v21 = vpop.f32.mrf.mxu1  ;;  %v6079_v17 = vpop.f32.mrf.mxu0 }
 0x23d   : > { %v1737_v9 = vadd.f32 %v6058_v21, %v1654_v34 }
 0x23e   : > { %v1728_v30 = vpop.f32.mrf.mxu1  ;;  %v1975_v0 = vpop.f32.mrf.mxu0 }
 0x23f   : > { %v1729_v44 = vadd.f32 %v1728_v30, %v1647_v10  ;;  %v1820_v42 = vadd.f32 %v6065_v50, %v1737_v9 }
 0x241   : > { %v1814_v51 = vadd.f32 %v1813_v33, %v1729_v44 }
 0x242   : > { %v6072_v22 = vpop.f32.mrf.mxu1  ;;  %v6093_v8 = vpop.f32.mrf.mxu0 }
 0x243   : > { %v1899_v54 = vadd.f32 %v6072_v22, %v1820_v42 }
 0x244   : > { %v1892_v35 = vpop.f32.mrf.mxu1  ;;  %v2148_v14 = vpop.f32.mrf.mxu0 }
 0x245   : > { %5417 = vst.msk [vmem:[%s7406_s18 + $0x8] sm:$0xff] %vm239_vm0, %v1899_v54  ;;  %v1893_v41 = vadd.f32 %v1892_v35, %v1814_v51 }
 0x247   : > { %5416 = vst.msk [vmem:[%s7406_s18] sm:$0xff] %vm239_vm0, %v1893_v41 }
 0x248   : > { %v6086_v46 = vpop.f32.mrf.mxu1  ;;  %v6107_v32 = vpop.f32.mrf.mxu0 }
 0x249   : > { %v2073_v49 = vadd.f32 %v6086_v46, %v6079_v17 }
 0x24a   : > { %v2066_v3 = vpop.f32.mrf.mxu1  ;;  %v2315_v53 = vpop.f32.mrf.mxu0 }
 0x24b   : > { %v2067_v55 = vadd.f32 %v2066_v3, %v1975_v0  ;;  %v2156_v56 = vadd.f32 %v6093_v8, %v2073_v49 }
 0x24d   : > { %v2149_v39 = vadd.f32 %v2148_v14, %v2067_v55 }
 0x24e   : > { %v6100_v59 = vpop.f32.mrf.mxu1  ;;  %v6121_v23 = vpop.f32.mrf.mxu0 }
 0x24f   : > { %v2239_v60 = vadd.f32 %v6100_v59, %v2156_v56 }
 0x250   : > { %v2230_v58 = vpop.f32.mrf.mxu1  ;;  %v2477_v2 = vpop.f32.mrf.mxu0 }
 0x251   : > { %v2231_v12 = vadd.f32 %v2230_v58, %v2149_v39  ;;  %v2322_v13 = vadd.f32 %v6107_v32, %v2239_v60 }
 0x253   : > { %v2316_v40 = vadd.f32 %v2315_v53, %v2231_v12 }
 0x254   : > { %v6114_v52 = vpop.f32.mrf.mxu1  ;;  %v6135_v19 = vpop.f32.mrf.mxu0 }
 0x255   : > { %v2401_v26 = vadd.f32 %v6114_v52, %v2322_v13 }
 0x256   : > { %v2394_v28 = vpop.f32.mrf.mxu1  ;;  %v2650_v29 = vpop.f32.mrf.mxu0 }
 0x257   : > { %5419 = vst.msk [vmem:[%s7406_s18 + $0x18] sm:$0xff] %vm239_vm0, %v2401_v26  ;;  %v2395_v24 = vadd.f32 %v2394_v28, %v2316_v40 }
 0x259   : > { %5418 = vst.msk [vmem:[%s7406_s18 + $0x10] sm:$0xff] %vm239_vm0, %v2395_v24 }
 0x25a   : > { %v6128_v11 = vpop.f32.mrf.mxu1  ;;  %v6149_v25 = vpop.f32.mrf.mxu0 }
 0x25b   : > { %v2575_v62 = vadd.f32 %v6128_v11, %v6121_v23 }
 0x25c   : > { %v2568_v37 = vpop.f32.mrf.mxu1  ;;  %v2817_v47 = vpop.f32.mrf.mxu0 }
 0x25d   : > { %v2569_v6 = vadd.f32 %v2568_v37, %v2477_v2  ;;  %v2658_v57 = vadd.f32 %v6135_v19, %v2575_v62 }
 0x25f   : > { %v2651_v15 = vadd.f32 %v2650_v29, %v2569_v6 }
 0x260   : > { %v6142_v38 = vpop.f32.mrf.mxu1  ;;  %v6163_v48 = vpop.f32.mrf.mxu0 }
 0x261   : > { %v2741_v27 = vadd.f32 %v6142_v38, %v2658_v57 }
 0x262   : > { %v2732_v61 = vpop.f32.mrf.mxu1  ;;  %v2979_v63 = vpop.f32.mrf.mxu0 }
 0x263   : > { %v2733_v1 = vadd.f32 %v2732_v61, %v2651_v15  ;;  %v2824_v5 = vadd.f32 %v6149_v25, %v2741_v27 }
 0x265   : > { %v2818_v20 = vadd.f32 %v2817_v47, %v2733_v1 }
 0x266   : > { %v6156_v16 = vpop.f32.mrf.mxu1  ;;  %v6177_v45 = vpop.f32.mrf.mxu0 }
 0x267   : > { %v2903_v36 = vadd.f32 %v6156_v16, %v2824_v5 }
 0x268   : > { %v2896_v18 = vpop.f32.mrf.mxu1  ;;  %v3152_v43 = vpop.f32.mrf.mxu0 }
 0x269   : > { %5421 = vst.msk [vmem:[%s7406_s18 + $0x28] sm:$0xff] %vm239_vm0, %v2903_v36  ;;  %v2897_v50 = vadd.f32 %v2896_v18, %v2818_v20 }
 0x26b   : > { %5420 = vst.msk [vmem:[%s7406_s18 + $0x20] sm:$0xff] %vm239_vm0, %v2897_v50 }
 0x26c   : > { %v6170_v31 = vpop.f32.mrf.mxu1  ;;  %v6191_v4 = vpop.f32.mrf.mxu0 }
 0x26d   : > { %v3077_v33 = vadd.f32 %v6170_v31, %v6163_v48 }
 0x26e   : > { %v3070_v7 = vpop.f32.mrf.mxu1  ;;  %v3319_v34 = vpop.f32.mrf.mxu0 }
 0x26f   : > { %v3071_v10 = vadd.f32 %v3070_v7, %v2979_v63  ;;  %v3160_v21 = vadd.f32 %v6177_v45, %v3077_v33 }
 0x271   : > { %v3153_v17 = vadd.f32 %v3152_v43, %v3071_v10 }
 0x272   : > { %v6184_v9 = vpop.f32.mrf.mxu1  ;;  %v6205_v30 = vpop.f32.mrf.mxu0 }
 0x273   : > { %v3243_v0 = vadd.f32 %v6184_v9, %v3160_v21 }
 0x274   : > { %v3234_v44 = vpop.f32.mrf.mxu1  ;;  %v3481_v42 = vpop.f32.mrf.mxu0 }
 0x275   : > { %v3235_v51 = vadd.f32 %v3234_v44, %v3153_v17  ;;  %v3326_v22 = vadd.f32 %v6191_v4, %v3243_v0 }
 0x277   : > { %v3320_v8 = vadd.f32 %v3319_v34, %v3235_v51 }
 0x278   : > { %v6198_v54 = vpop.f32.mrf.mxu1  ;;  %v6219_v35 = vpop.f32.mrf.mxu0 }
 0x279   : > { %v3405_v14 = vadd.f32 %v6198_v54, %v3326_v22 }
 0x27a   : > { %v3398_v41 = vpop.f32.mrf.mxu1  ;;  %v3654_v46 = vpop.f32.mrf.mxu0 }
 0x27b   : > { %5423 = vst.msk [vmem:[%s7406_s18 + $0x38] sm:$0xff] %vm239_vm0, %v3405_v14  ;;  %v3399_v32 = vadd.f32 %v3398_v41, %v3320_v8 }
 0x27d   : > { %5422 = vst.msk [vmem:[%s7406_s18 + $0x30] sm:$0xff] %vm239_vm0, %v3399_v32 }
 0x27e   : > { %v6212_v49 = vpop.f32.mrf.mxu1  ;;  %v6233_v3 = vpop.f32.mrf.mxu0 }
 0x27f   : > { %v3579_v53 = vadd.f32 %v6212_v49, %v6205_v30 }
 0x280   : > { %v3572_v55 = vpop.f32.mrf.mxu1  ;;  %v3821_v56 = vpop.f32.mrf.mxu0 }
 0x281   : > { %v3573_v39 = vadd.f32 %v3572_v55, %v3481_v42  ;;  %v3662_v59 = vadd.f32 %v6219_v35, %v3579_v53 }
 0x283   : > { %v3655_v23 = vadd.f32 %v3654_v46, %v3573_v39 }
 0x284   : > { %v6226_v60 = vpop.f32.mrf.mxu1  ;;  %v6247_v58 = vpop.f32.mrf.mxu0 }
 0x285   : > { %v3745_v2 = vadd.f32 %v6226_v60, %v3662_v59 }
 0x286   : > { %v3736_v12 = vpop.f32.mrf.mxu1  ;;  %v3983_v13 = vpop.f32.mrf.mxu0 }
 0x287   : > { %v3737_v40 = vadd.f32 %v3736_v12, %v3655_v23  ;;  %v3828_v52 = vadd.f32 %v6233_v3, %v3745_v2 }
 0x289   : > { %v3822_v19 = vadd.f32 %v3821_v56, %v3737_v40 }
 0x28a   : > { %v6240_v26 = vpop.f32.mrf.mxu1  ;;  %v6261_v28 = vpop.f32.mrf.mxu0 }
 0x28b   : > { %v3907_v29 = vadd.f32 %v6240_v26, %v3828_v52 }
 0x28c   : > { %v3900_v24 = vpop.f32.mrf.mxu1  ;;  %v4156_v11 = vpop.f32.mrf.mxu0 }
 0x28d   : > { %5425 = vst.msk [vmem:[%s7406_s18 + $0x48] sm:$0xff] %vm239_vm0, %v3907_v29  ;;  %v3901_v25 = vadd.f32 %v3900_v24, %v3822_v19 }
 0x28f   : > { %5424 = vst.msk [vmem:[%s7406_s18 + $0x40] sm:$0xff] %vm239_vm0, %v3901_v25 }
 0x290   : > { %v6254_v62 = vpop.f32.mrf.mxu1  ;;  %v6275_v37 = vpop.f32.mrf.mxu0 }
 0x291   : > { %v4081_v47 = vadd.f32 %v6254_v62, %v6247_v58 }
 0x292   : > { %v4074_v6 = vpop.f32.mrf.mxu1  ;;  %v4323_v57 = vpop.f32.mrf.mxu0 }
 0x293   : > { %v4075_v15 = vadd.f32 %v4074_v6, %v3983_v13  ;;  %v4164_v38 = vadd.f32 %v6261_v28, %v4081_v47 }
 0x295   : > { %v4157_v48 = vadd.f32 %v4156_v11, %v4075_v15 }
 0x296   : > { %v6268_v27 = vpop.f32.mrf.mxu1  ;;  %v6289_v61 = vpop.f32.mrf.mxu0 }
 0x297   : > { %v4247_v63 = vadd.f32 %v6268_v27, %v4164_v38 }
 0x298   : > { %v4238_v1 = vpop.f32.mrf.mxu1  ;;  %v4485_v5 = vpop.f32.mrf.mxu0 }
 0x299   : > { %v4239_v20 = vadd.f32 %v4238_v1, %v4157_v48  ;;  %v4330_v16 = vadd.f32 %v6275_v37, %v4247_v63 }
 0x29b   : > { %v4324_v45 = vadd.f32 %v4323_v57, %v4239_v20 }
 0x29c   : > { %v6282_v36 = vpop.f32.mrf.mxu1  ;;  %v6303_v18 = vpop.f32.mrf.mxu0 }
 0x29d   : > { %v4409_v43 = vadd.f32 %v6282_v36, %v4330_v16 }
 0x29e   : > { %v4402_v50 = vpop.f32.mrf.mxu1  ;;  %v4658_v31 = vpop.f32.mrf.mxu0 }
 0x29f   : > { %5427 = vst.msk [vmem:[%s7406_s18 + $0x58] sm:$0xff] %vm239_vm0, %v4409_v43  ;;  %v4403_v4 = vadd.f32 %v4402_v50, %v4324_v45 }
 0x2a1   : > { %5426 = vst.msk [vmem:[%s7406_s18 + $0x50] sm:$0xff] %vm239_vm0, %v4403_v4 }
 0x2a2   : > { %v6296_v33 = vpop.f32.mrf.mxu1  ;;  %v6317_v7 = vpop.f32.mrf.mxu0 }
 0x2a3   : > { %v4583_v34 = vadd.f32 %v6296_v33, %v6289_v61 }
 0x2a4   : > { %v4576_v10 = vpop.f32.mrf.mxu1  ;;  %v4825_v21 = vpop.f32.mrf.mxu0 }
 0x2a5   : > { %v4577_v17 = vadd.f32 %v4576_v10, %v4485_v5  ;;  %v4666_v9 = vadd.f32 %v6303_v18, %v4583_v34 }
 0x2a7   : > { %v4659_v30 = vadd.f32 %v4658_v31, %v4577_v17 }
 0x2a8   : > { %v6310_v0 = vpop.f32.mrf.mxu1  ;;  %v6331_v44 = vpop.f32.mrf.mxu0 }
 0x2a9   : > { %v4749_v42 = vadd.f32 %v6310_v0, %v4666_v9 }
 0x2aa   : > { %v4740_v51 = vpop.f32.mrf.mxu1  ;;  %v4987_v54 = vpop.f32.mrf.mxu0 }
 0x2ab   : > { %v4741_v22 = vadd.f32 %v4740_v51, %v4659_v30  ;;  %v4832_v8 = vadd.f32 %v6317_v7, %v4749_v42 }
 0x2ad   : > { %v4826_v35 = vadd.f32 %v4825_v21, %v4741_v22 }
 0x2ae   : > { %v6324_v14 = vpop.f32.mrf.mxu1  ;;  %v6345_v46 = vpop.f32.mrf.mxu0 }
 0x2af   : > { %v4911_v41 = vadd.f32 %v6324_v14, %v4832_v8 }
 0x2b0   : > { %v4904_v32 = vpop.f32.mrf.mxu1  ;;  %v5160_v53 = vpop.f32.mrf.mxu0 }
 0x2b1   : > { %5429 = vst.msk [vmem:[%s7406_s18 + $0x68] sm:$0xff] %vm239_vm0, %v4911_v41  ;;  %v4905_v49 = vadd.f32 %v4904_v32, %v4826_v35 }
 0x2b3   : > { %5428 = vst.msk [vmem:[%s7406_s18 + $0x60] sm:$0xff] %vm239_vm0, %v4905_v49  ;;  %v6338_v3 = vpop.f32.mrf.mxu1 }
 0x2b4   : > { %v5085_v55 = vadd.f32 %v6338_v3, %v6331_v44 }
 0x2b5   : > { %v5078_v56 = vpop.f32.mrf.mxu1  ;;  %v6359_v60 = vpop.f32.mrf.mxu0 }
 0x2b6   : > { %v5079_v39 = vadd.f32 %v5078_v56, %v4987_v54  ;;  %v5168_v59 = vadd.f32 %v6345_v46, %v5085_v55 }
 0x2b7   : > { %v6352_v23 = vpop.f32.mrf.mxu1  ;;  %v5327_v52 = vpop.f32.mrf.mxu0 }
 0x2b8   : > { %v5161_v58 = vadd.f32 %v5160_v53, %v5079_v39  ;;  %v5251_v2 = vadd.f32 %v6352_v23, %v5168_v59 }
 0x2b9   : > { %v5242_v12 = vpop.f32.mrf.mxu1 }
 0x2ba   : > { %v5243_v13 = vadd.f32 %v5242_v12, %v5161_v58  ;;  %v5334_v40 = vadd.f32 %v6359_v60, %v5251_v2 }
 0x2bb   : > { %v6366_v19 = vpop.f32.mrf.mxu1 }
 0x2bc   : > { %v5328_v26 = vadd.f32 %v5327_v52, %v5243_v13  ;;  %v5413_v28 = vadd.f32 %v6366_v19, %v5334_v40 }
 0x2bd   : > { %v5406_v29 = vpop.f32.mrf.mxu1 }
 0x2be   : > { %5431 = vst.msk [vmem:[%s7406_s18 + $0x78] sm:$0xff] %vm239_vm0, %v5413_v28  ;;  %v5407_v24 = vadd.f32 %v5406_v29, %v5328_v26 }
 0x2c0   : > { %5430 = vst.msk [vmem:[%s7406_s18 + $0x70] sm:$0xff] %vm239_vm0, %v5407_v24 }
 0x2c1   : > { %6531 = shalt.err (!%p6528_p3)
}
 0x2c2   : > { %s6532_s17 = scalar_lea.hbm %s7441_s29, 2048  ;;  %s6536_s26 = scalar_lea.hbm %s7493_s3, 4096 }
 0x2c3   : > { %p6533_p11 = scmp.ne.s32.totalorder %s7441_s29, %s6532_s17  ;;  %p6537_p4 = scmp.lt.s32.totalorder %s7441_s29, %s7493_s3 }
 0x2c4   : > { %p6538_p6 = scmp.lt.s32.totalorder %s6536_s26, %s6532_s17 }
 0x2c5   : > { %p6534_p9 = pnand %p6533_p11, %p7508_p2 }
 0x2c6   : > { %p6539_p8 = por %p6538_p6, %p6537_p4 }
 0x2c7   : > { %p6535_p1 = pneg %p6534_p9 }
 0x2c9   : > { %p6540_p5 = pnand %p6539_p8, %p6535_p1 }
 0x2cb   : > { %6543 = shalt.err (!%p6540_p5)
}
 0x2cc   : > { %s6594_s30 = smov 128   ;;  %s6595_s18 = smov 8  }
 0x2cd   : > { %6377 = dma.vmem_to_hbm [thread:$0]  (%p7508_p2), %s7443_s27, 2048, %s7441_s29, %s5433_s16, %s6594_s30, %s6594_s30, %s6595_s18  }
 0x2ce PF: > { %s5462_s20 = sand.u32 1, %s6574_s12   ;;  %p7509_p7 = scmp.ne.s32.totalorder %s7499_s19, 0 }
 0x2cf   : > { %p7510_p12 = scmp.ge.s32.totalorder %s6586_s15, 2  ;;  %s5463_s28 = scalar_lea.sflag [#allocation4], %s5462_s20 }
 0x2d1   : > { %p6391_p13 = pnand %p7510_p12, %p7509_p7 }
 0x2d3   : > { %p6392_p0 = pneg %p6391_p13 }
 0x2d5   : > { %6569 = dma.done.wait (%p6392_p0), %s5463_s28, 2048  }
 0x2d6   : > { %6571 = vsyncadd (%p6392_p0), %s5463_s28, 4294965248  ;;  %p17_p10 = scmp.ge.s32.totalorder %s6694_s7, 4   ;;  %s7511_s12 = smov %s6578_s13 }
 0x2d7   : > { %s7512_s13 = smov %s6582_s14  ;;  %s7513_s14 = smov %s6710_s11 }
 0x2d8   : > { %s7514_s15 = smov %s6694_s7  ;;  %19 = sbr.rel (!%p17_p10) target bundleno = 6 (0x6), region = 85 }
 0x2dd   :  { %5468 = vsyncpa [#allocation3], 1 }
 0x2de   :  { %5470 = vsyncpa [#allocation3 + $0x1], 1 }
 0x2df   :  { %5471 = vsyncpa [#allocation6], 1 }
 0x2e0   :  { %5472 = vsyncpa [#allocation4], 1 }
 0x2e1   :  { %5474 = vsyncpa [#allocation4 + $0x1], 1 }

</bundles_post_ra>
